<compile_context>
chip_gen: v7x
topology: tpu7x:2x2x1
jax: 0.10.0
libtpu: 0.0.40
codegen_flags: <defaults>
</compile_context>

<pallas_src>
import jax
import jax.numpy as jnp
from jax.experimental import pallas as pl
from jax.experimental.pallas import tpu as pltpu

_LANES = 128              # padded output-channel / feature width (lane-dense)
_SUB = 16                 # row-tile granularity (bf16 packs 16 rows per vreg)
_K1PAD = 32               # conv1 im2col K: 1*5*5 = 25 -> 32  (sublane multiple)
_K2PAD = 160              # conv2 im2col K: 6*5*5 = 150 -> 160 (sublane multiple)
_CONV1_MAX_TM = 2048      # Kpad=32 : ~1 MB double-buffered bf16 patch tile
_CONV2_MAX_TM = 1024      # Kpad=160: ~2.5 MB double-buffered bf16 patch tile
_FC_MAX_TB = 1024
_VMEM_LIMIT = 32 * 1024 * 1024   # safe on v5e/v6e/v7x (<= v7x scoped default)


def _round_up(x, m):
    return (x + m - 1) // m * m


def _pick_tile(m, max_tile):
    """Row tile: multiple of _SUB, <= max_tile, and >= 2 grid steps whenever
    the row count allows it (so both v7x TensorCores get work)."""
    full = _round_up(m, _SUB)
    tile = min(max_tile, full)
    if tile == full and m > _SUB:          # would be a 1-step grid -> split
        tile = _round_up((m + 1) // 2, _SUB)
    return tile


# ----------------------------- Pallas kernels ------------------------------

def _conv_tanh_pool_kernel(x_ref, w_ref, b_ref, o_ref):
    """Fused im2col-conv + 2x2 maxpool + bias + tanh.

    x_ref: (4, TM, Kpad) bf16  patch rows for the 4 positions of each pool win
    w_ref: (Kpad, 128)   bf16  resident weight
    b_ref: (1, 128)      f32   resident bias
    o_ref: (TM, 128)     bf16  pooled tanh activations (lane-dense)

    max-before-(bias+tanh) is exact: tanh is monotone and the bias is the same
    for all 4 positions, so tanh(max_j s_j + b) == max_j tanh(s_j + b).
    """
    w = w_ref[...]
    acc = jnp.dot(x_ref[0], w, preferred_element_type=jnp.float32)
    for j in range(1, 4):                                   # static unroll
        acc = jnp.maximum(
            acc, jnp.dot(x_ref[j], w, preferred_element_type=jnp.float32))
    o_ref[...] = jnp.tanh(acc + b_ref[...]).astype(o_ref.dtype)


def _fc_kernel(x_ref, w1_ref, b1_ref, w2_ref, b2_ref, w3_ref, b3_ref, o_ref):
    """Fused fc1+tanh -> fc2+tanh -> fc3.  bf16 MXU inputs, f32 accumulation.
    All (padded) weights resident in VMEM."""
    h = jnp.tanh(jnp.dot(x_ref[...], w1_ref[...],
                         preferred_element_type=jnp.float32) + b1_ref[...])
    h = jnp.tanh(jnp.dot(h.astype(jnp.bfloat16), w2_ref[...],
                         preferred_element_type=jnp.float32) + b2_ref[...])
    o_ref[...] = jnp.dot(h.astype(jnp.bfloat16), w3_ref[...],
                         preferred_element_type=jnp.float32) + b3_ref[...]


# ------------------------------ kernel wrappers ------------------------------

def conv_tanh_pool(patches, w, b, max_tm):
    """patches: (4, M, Kpad) bf16, w: (Kpad, 128) bf16, b: (128,) f32
    -> (M, 128) bf16."""
    _, M, Kpad = patches.shape
    Npad = w.shape[1]
    TM = _pick_tile(M, max_tm)
    Mpad = _round_up(M, TM)
    if Mpad != M:
        patches = jnp.pad(patches, ((0, 0), (0, Mpad - M), (0, 0)))
    out = pl.pallas_call(
        _conv_tanh_pool_kernel,
        out_shape=jax.ShapeDtypeStruct((Mpad, Npad), jnp.bfloat16),
        grid=(Mpad // TM,),
        in_specs=[
            pl.BlockSpec((4, TM, Kpad), lambda i: (0, i, 0)),   # patch tile
            pl.BlockSpec((Kpad, Npad), lambda i: (0, 0)),       # resident w
            pl.BlockSpec((1, Npad), lambda i: (0, 0)),          # resident b
        ],
        out_specs=pl.BlockSpec((TM, Npad), lambda i: (i, 0)),
        compiler_params=pltpu.CompilerParams(
            dimension_semantics=("parallel",),
            vmem_limit_bytes=_VMEM_LIMIT),
        cost_estimate=pl.CostEstimate(
            flops=2 * 4 * Mpad * Kpad * Npad,
            transcendentals=Mpad * Npad,
            bytes_accessed=2 * (4 * Mpad * Kpad + Kpad * Npad + Mpad * Npad)
                           + 4 * Npad),
    )(patches, w, b.reshape(1, Npad))
    return out[:M]


def fc_stack(x, w1, b1, w2, b2, w3, b3):
    """x: (B, K1) bf16; padded bf16 weights / f32 biases resident.
    Returns (B, N3pad) f32."""
    B, K1 = x.shape
    N1, N2, N3 = w1.shape[1], w2.shape[1], w3.shape[1]
    TB = _pick_tile(B, _FC_MAX_TB)
    Bpad = _round_up(B, TB)
    if Bpad != B:
        x = jnp.pad(x, ((0, Bpad - B), (0, 0)))
    out = pl.pallas_call(
        _fc_kernel,
        out_shape=jax.ShapeDtypeStruct((Bpad, N3), jnp.float32),
        grid=(Bpad // TB,),
        in_specs=[
            pl.BlockSpec((TB, K1), lambda i: (i, 0)),
            pl.BlockSpec((K1, N1), lambda i: (0, 0)),
            pl.BlockSpec((1, N1), lambda i: (0, 0)),
            pl.BlockSpec((N1, N2), lambda i: (0, 0)),
            pl.BlockSpec((1, N2), lambda i: (0, 0)),
            pl.BlockSpec((N2, N3), lambda i: (0, 0)),
            pl.BlockSpec((1, N3), lambda i: (0, 0)),
        ],
        out_specs=pl.BlockSpec((TB, N3), lambda i: (i, 0)),
        compiler_params=pltpu.CompilerParams(
            dimension_semantics=("parallel",),
            vmem_limit_bytes=_VMEM_LIMIT),
        cost_estimate=pl.CostEstimate(
            flops=2 * Bpad * (K1 * N1 + N1 * N2 + N2 * N3),
            transcendentals=Bpad * (N1 + N2),
            bytes_accessed=2 * (Bpad * K1 + K1 * N1 + N1 * N2 + N2 * N3)
                           + 4 * Bpad * N3),
    )(x, w1, b1.reshape(1, N1), w2, b2.reshape(1, N2), w3, b3.reshape(1, N3))
    return out[:B]


# ------------------------------- host glue ----------------------------------

def _pooled_patches(x, k, k_pad):
    """x: (B, H, W, C) NHWC (bf16).  Valid conv (kernel k) then 2x2/2 pool.

    Returns (4, B*Hp*Wp, k_pad): leading axis = the 4 pool-window positions;
    each row is a conv patch flattened in (kh, kw, Cin) order, zero-padded."""
    B, H, W, C = x.shape
    Ho, Wo = H - k + 1, W - k + 1
    Hp, Wp = Ho // 2, Wo // 2
    pos = []
    for dy in range(2):
        for dx in range(2):
            cols = []
            for ki in range(k):
                for kj in range(k):
                    sub = x[:, dy + ki: dy + ki + 2 * Hp: 2,
                            dx + kj: dx + kj + 2 * Wp: 2, :]   # (B, Hp, Wp, C)
                    cols.append(sub)
            p = jnp.stack(cols, axis=3)                        # (B,Hp,Wp,k*k,C)
            pos.append(p.reshape(B * Hp * Wp, k * k * C))
    patches = jnp.stack(pos, axis=0)                           # (4, M, k*k*C)
    if k_pad > k * k * C:
        patches = jnp.pad(patches, ((0, 0), (0, 0), (0, k_pad - k * k * C)))
    return patches


def _prep_conv_weight(w, b, k_pad, n_pad):
    """torch (Cout, Cin, kh, kw) -> padded bf16 (k_pad, n_pad) matmul weight."""
    Cout, Cin, kh, kw = w.shape
    wm = jnp.transpose(w, (2, 3, 1, 0)).reshape(kh * kw * Cin, Cout)
    wm = jnp.pad(wm, ((0, k_pad - kh * kw * Cin), (0, n_pad - Cout)))
    bb = jnp.pad(b, (0, n_pad - Cout))
    return wm.astype(jnp.bfloat16), bb.astype(jnp.float32)


# ------------------------------- parameters ---------------------------------

def init_params(key):
    """Deterministic PyTorch-default-style init (uniform +/- 1/sqrt(fan_in))."""
    def uni(k, shape, fan_in):
        bound = 1.0 / float(fan_in) ** 0.5
        return jax.random.uniform(k, shape, jnp.float32, -bound, bound)

    ks = jax.random.split(key, 10)
    return {
        "w1": uni(ks[0], (6, 1, 5, 5), 25),       # Conv2d(1, 6, 5)
        "b1": uni(ks[1], (6,), 25),
        "w2": uni(ks[2], (16, 6, 5, 5), 150),     # Conv2d(6, 16, 5)
        "b2": uni(ks[3], (16,), 150),
        "fc1_w": uni(ks[4], (120, 400), 400),     # Linear(16*25, 120)
        "fc1_b": uni(ks[5], (120,), 400),
        "fc2_w": uni(ks[6], (84, 120), 120),      # Linear(120, 84)
        "fc2_b": uni(ks[7], (84,), 120),
        "fc3_w": uni(ks[8], (10, 84), 84),        # Linear(84, 10)
        "fc3_b": uni(ks[9], (10,), 84),
    }


# --------------------------------- forward ----------------------------------

def lenet5_forward(params, x):
    # x: (B, 32, 32) -- LeNet5's view(-1, 16*25) forces 32x32 spatial input.
    B = x.shape[0]
    xin = x.astype(jnp.bfloat16)[:, :, :, None]              # NHWC, C=1, bf16

    # conv1 (1->6, k=5) + tanh + maxpool2  [fused Pallas kernel]
    w1, b1 = _prep_conv_weight(params["w1"], params["b1"], _K1PAD, _LANES)
    p1 = _pooled_patches(xin, 5, _K1PAD)                     # (4, B*196, 32)
    a1 = conv_tanh_pool(p1, w1, b1, _CONV1_MAX_TM)           # (B*196, 128) bf16
    a1 = a1[:, :6].reshape(B, 14, 14, 6)                     # NHWC

    # conv2 (6->16, k=5) + tanh + maxpool2  [fused Pallas kernel]
    w2, b2 = _prep_conv_weight(params["w2"], params["b2"], _K2PAD, _LANES)
    p2 = _pooled_patches(a1, 5, _K2PAD)                      # (4, B*25, 160)
    a2 = conv_tanh_pool(p2, w2, b2, _CONV2_MAX_TM)           # (B*25, 128) bf16
    feat = a2[:, :16].reshape(B, 400)                        # (h, w, c) order

    # fc1+tanh -> fc2+tanh -> fc3  [one fused Pallas kernel].  Torch flattens
    # NCHW, we flatten NHWC: fold the permutation into the fc1 weight columns.
    w1f = (params["fc1_w"].reshape(120, 16, 5, 5)
           .transpose(0, 2, 3, 1).reshape(120, 400))
    w1k = jnp.pad(w1f.T, ((0, 0), (0, _LANES - 120))).astype(jnp.bfloat16)
    b1k = jnp.pad(params["fc1_b"], (0, _LANES - 120))
    w2k = jnp.pad(params["fc2_w"].T,
                  ((0, _LANES - 120), (0, _LANES - 84))).astype(jnp.bfloat16)
    b2k = jnp.pad(params["fc2_b"], (0, _LANES - 84))
    w3k = jnp.pad(params["fc3_w"].T,
                  ((0, _LANES - 84), (0, _LANES - 10))).astype(jnp.bfloat16)
    b3k = jnp.pad(params["fc3_b"], (0, _LANES - 10))
    out = fc_stack(feat, w1k, b1k, w2k, b2k, w3k, b3k)       # (B, 128) f32
    return out[:, :10]


# ------------------------- pure-JAX reference (check) ------------------------

def lenet5_reference(params, x):
    hp = jax.lax.Precision.HIGHEST
    y = x[:, None, :, :]
    y = jax.lax.conv_general_dilated(
        y, params["w1"], (1, 1), "VALID",
        dimension_numbers=("NCHW", "OIHW", "NCHW"), precision=hp)
    y = jnp.tanh(y + params["b1"][None, :, None, None])
    b, c, h, w = y.shape
    y = y.reshape(b, c, h // 2, 2, w // 2, 2).max(axis=(3, 5))
    y = jax.lax.conv_general_dilated(
        y, params["w2"], (1, 1), "VALID",
        dimension_numbers=("NCHW", "OIHW", "NCHW"), precision=hp)
    y = jnp.tanh(y + params["b2"][None, :, None, None])
    b, c, h, w = y.shape
    y = y.reshape(b, c, h // 2, 2, w // 2, 2).max(axis=(3, 5))
    f = y.reshape(b, -1)
    hdn = jnp.tanh(jnp.dot(f, params["fc1_w"].T, precision=hp) + params["fc1_b"])
    hdn = jnp.tanh(jnp.dot(hdn, params["fc2_w"].T, precision=hp) + params["fc2_b"])
    return jnp.dot(hdn, params["fc3_w"].T, precision=hp) + params["fc3_b"]


if __name__ == "__main__":
    key = jax.random.PRNGKey(0)
    pkey, xkey = jax.random.split(key)
    params = init_params(pkey)
    x = jax.random.normal(xkey, (2, 32, 32), jnp.float32)

    out = jax.block_until_ready(jax.jit(lenet5_forward)(params, x))
    assert out.shape == (2, 10) and out.dtype == jnp.float32

    ref = jax.block_until_ready(jax.jit(lenet5_reference)(params, x))
    err = float(jnp.max(jnp.abs(out - ref)))
    # bf16 MXU inputs + bf16 conv activations (f32 accumulation) -> mixed-
    # precision tolerance vs the pure-f32 reference.
    assert err < 5e-2, f"max abs error vs f32 reference: {err}"
    print("KERNEL_OK")
</pallas_src>

<mosaic_0001>
module attributes {stable_mosaic.version = 11 : i64} {
  func.func @_conv_tanh_pool_kernel(%arg0: i32, %arg1: memref<4x208x32xbf16, #tpu.memory_space<vmem>>, %arg2: memref<32x128xbf16, #tpu.memory_space<vmem>>, %arg3: memref<1x128xf32, #tpu.memory_space<vmem>>, %arg4: memref<208x128xbf16, #tpu.memory_space<vmem>>) attributes {dimension_semantics = [#tpu.dimension_semantics<parallel>], iteration_bounds = array<i64: 2>, scalar_prefetch = 0 : i64, scratch_operands = 0 : i64, tpu.core_type = #tpu.core_type<tc>, window_params = [{transform_indices = @transform_0, window_bounds = array<i64: 4, 208, 32>}, {pipeline_mode = #tpu.pipeline_mode<synchronous>, transform_indices = @transform_1, window_bounds = array<i64: 32, 128>}, {pipeline_mode = #tpu.pipeline_mode<synchronous>, transform_indices = @transform_2, window_bounds = array<i64: 1, 128>}, {transform_indices = @transform_3, window_bounds = array<i64: 208, 128>}]} {
    %c0 = arith.constant 0 : index
    %c0_0 = arith.constant 0 : index
    %0 = vector.load %arg2[%c0, %c0_0] : memref<32x128xbf16, #tpu.memory_space<vmem>>, vector<32x128xbf16>
    %c0_1 = arith.constant 0 : index
    %c0_2 = arith.constant 0 : index
    %c0_3 = arith.constant 0 : index
    %1 = vector.load %arg1[%c0_1, %c0_2, %c0_3] : memref<4x208x32xbf16, #tpu.memory_space<vmem>>, vector<1x208x32xbf16>
    %2 = vector.shape_cast %1 : vector<1x208x32xbf16> to vector<208x32xbf16>
    %cst = arith.constant dense<0.000000e+00> : vector<208x128xf32>
    %3 = tpu.matmul %2, %0, %cst {dimension_numbers = #tpu.dot_dimension_numbers<[1], [0], [0], [1], [0, 0, 1, 1], [], []>} : vector<208x32xbf16>, vector<32x128xbf16>, vector<208x128xf32> -> vector<208x128xf32>
    %c1 = arith.constant 1 : index
    %c0_4 = arith.constant 0 : index
    %c0_5 = arith.constant 0 : index
    %4 = vector.load %arg1[%c1, %c0_4, %c0_5] : memref<4x208x32xbf16, #tpu.memory_space<vmem>>, vector<1x208x32xbf16>
    %5 = vector.shape_cast %4 : vector<1x208x32xbf16> to vector<208x32xbf16>
    %cst_6 = arith.constant dense<0.000000e+00> : vector<208x128xf32>
    %6 = tpu.matmul %5, %0, %cst_6 {dimension_numbers = #tpu.dot_dimension_numbers<[1], [0], [0], [1], [0, 0, 1, 1], [], []>} : vector<208x32xbf16>, vector<32x128xbf16>, vector<208x128xf32> -> vector<208x128xf32>
    %7 = arith.maximumf %3, %6 : vector<208x128xf32>
    %c2 = arith.constant 2 : index
    %c0_7 = arith.constant 0 : index
    %c0_8 = arith.constant 0 : index
    %8 = vector.load %arg1[%c2, %c0_7, %c0_8] : memref<4x208x32xbf16, #tpu.memory_space<vmem>>, vector<1x208x32xbf16>
    %9 = vector.shape_cast %8 : vector<1x208x32xbf16> to vector<208x32xbf16>
    %cst_9 = arith.constant dense<0.000000e+00> : vector<208x128xf32>
    %10 = tpu.matmul %9, %0, %cst_9 {dimension_numbers = #tpu.dot_dimension_numbers<[1], [0], [0], [1], [0, 0, 1, 1], [], []>} : vector<208x32xbf16>, vector<32x128xbf16>, vector<208x128xf32> -> vector<208x128xf32>
    %11 = arith.maximumf %7, %10 : vector<208x128xf32>
    %c3 = arith.constant 3 : index
    %c0_10 = arith.constant 0 : index
    %c0_11 = arith.constant 0 : index
    %12 = vector.load %arg1[%c3, %c0_10, %c0_11] : memref<4x208x32xbf16, #tpu.memory_space<vmem>>, vector<1x208x32xbf16>
    %13 = vector.shape_cast %12 : vector<1x208x32xbf16> to vector<208x32xbf16>
    %cst_12 = arith.constant dense<0.000000e+00> : vector<208x128xf32>
    %14 = tpu.matmul %13, %0, %cst_12 {dimension_numbers = #tpu.dot_dimension_numbers<[1], [0], [0], [1], [0, 0, 1, 1], [], []>} : vector<208x32xbf16>, vector<32x128xbf16>, vector<208x128xf32> -> vector<208x128xf32>
    %15 = arith.maximumf %11, %14 : vector<208x128xf32>
    %c0_13 = arith.constant 0 : index
    %c0_14 = arith.constant 0 : index
    %16 = vector.load %arg3[%c0_13, %c0_14] : memref<1x128xf32, #tpu.memory_space<vmem>>, vector<1x128xf32>
    %17 = vector.broadcast %16 : vector<1x128xf32> to vector<208x128xf32>
    %18 = arith.addf %15, %17 : vector<208x128xf32>
    %19 = math.tanh %18 : vector<208x128xf32>
    %20 = arith.truncf %19 : vector<208x128xf32> to vector<208x128xbf16>
    %c0_15 = arith.constant 0 : index
    %c0_16 = arith.constant 0 : index
    %21 = vector.load %arg4[%c0_15, %c0_16] : memref<208x128xbf16, #tpu.memory_space<vmem>>, vector<208x128xbf16>
    tpu.vector_store %arg4[%c0_15, %c0_16], %20 {strides = array<i32>} : memref<208x128xbf16, #tpu.memory_space<vmem>>, vector<208x128xbf16>,
    return
  }
  func.func @transform_0(%arg0: i32) -> (i32, i32, i32) {
    %c0_i32 = arith.constant 0 : i32
    %c0_i32_0 = arith.constant 0 : i32
    %c0_i32_1 = arith.constant 0 : i32
    return %c0_i32, %arg0, %c0_i32_0 : i32, i32, i32
  }
  func.func @transform_1(%arg0: i32) -> (i32, i32) {
    %c0_i32 = arith.constant 0 : i32
    %c0_i32_0 = arith.constant 0 : i32
    %c0_i32_1 = arith.constant 0 : i32
    return %c0_i32, %c0_i32_0 : i32, i32
  }
  func.func @transform_2(%arg0: i32) -> (i32, i32) {
    %c0_i32 = arith.constant 0 : i32
    %c0_i32_0 = arith.constant 0 : i32
    %c0_i32_1 = arith.constant 0 : i32
    return %c0_i32, %c0_i32_0 : i32, i32
  }
  func.func @transform_3(%arg0: i32) -> (i32, i32) {
    %c0_i32 = arith.constant 0 : i32
    %c0_i32_0 = arith.constant 0 : i32
    return %arg0, %c0_i32 : i32, i32
  }
}

module attributes {stable_mosaic.version = 11 : i64} {
  func.func @_conv_tanh_pool_kernel(%arg0: i32, %arg1: memref<4x32x160xbf16, #tpu.memory_space<vmem>>, %arg2: memref<160x128xbf16, #tpu.memory_space<vmem>>, %arg3: memref<1x128xf32, #tpu.memory_space<vmem>>, %arg4: memref<32x128xbf16, #tpu.memory_space<vmem>>) attributes {dimension_semantics = [#tpu.dimension_semantics<parallel>], iteration_bounds = array<i64: 2>, scalar_prefetch = 0 : i64, scratch_operands = 0 : i64, tpu.core_type = #tpu.core_type<tc>, window_params = [{transform_indices = @transform_0, window_bounds = array<i64: 4, 32, 160>}, {pipeline_mode = #tpu.pipeline_mode<synchronous>, transform_indices = @transform_1, window_bounds = array<i64: 160, 128>}, {pipeline_mode = #tpu.pipeline_mode<synchronous>, transform_indices = @transform_2, window_bounds = array<i64: 1, 128>}, {transform_indices = @transform_3, window_bounds = array<i64: 32, 128>}]} {
    %c0 = arith.constant 0 : index
    %c0_0 = arith.constant 0 : index
    %0 = vector.load %arg2[%c0, %c0_0] : memref<160x128xbf16, #tpu.memory_space<vmem>>, vector<160x128xbf16>
    %c0_1 = arith.constant 0 : index
    %c0_2 = arith.constant 0 : index
    %c0_3 = arith.constant 0 : index
    %1 = vector.load %arg1[%c0_1, %c0_2, %c0_3] : memref<4x32x160xbf16, #tpu.memory_space<vmem>>, vector<1x32x160xbf16>
    %2 = vector.shape_cast %1 : vector<1x32x160xbf16> to vector<32x160xbf16>
    %cst = arith.constant dense<0.000000e+00> : vector<32x128xf32>
    %3 = tpu.matmul %2, %0, %cst {dimension_numbers = #tpu.dot_dimension_numbers<[1], [0], [0], [1], [0, 0, 1, 1], [], []>} : vector<32x160xbf16>, vector<160x128xbf16>, vector<32x128xf32> -> vector<32x128xf32>
    %c1 = arith.constant 1 : index
    %c0_4 = arith.constant 0 : index
    %c0_5 = arith.constant 0 : index
    %4 = vector.load %arg1[%c1, %c0_4, %c0_5] : memref<4x32x160xbf16, #tpu.memory_space<vmem>>, vector<1x32x160xbf16>
    %5 = vector.shape_cast %4 : vector<1x32x160xbf16> to vector<32x160xbf16>
    %cst_6 = arith.constant dense<0.000000e+00> : vector<32x128xf32>
    %6 = tpu.matmul %5, %0, %cst_6 {dimension_numbers = #tpu.dot_dimension_numbers<[1], [0], [0], [1], [0, 0, 1, 1], [], []>} : vector<32x160xbf16>, vector<160x128xbf16>, vector<32x128xf32> -> vector<32x128xf32>
    %7 = arith.maximumf %3, %6 : vector<32x128xf32>
    %c2 = arith.constant 2 : index
    %c0_7 = arith.constant 0 : index
    %c0_8 = arith.constant 0 : index
    %8 = vector.load %arg1[%c2, %c0_7, %c0_8] : memref<4x32x160xbf16, #tpu.memory_space<vmem>>, vector<1x32x160xbf16>
    %9 = vector.shape_cast %8 : vector<1x32x160xbf16> to vector<32x160xbf16>
    %cst_9 = arith.constant dense<0.000000e+00> : vector<32x128xf32>
    %10 = tpu.matmul %9, %0, %cst_9 {dimension_numbers = #tpu.dot_dimension_numbers<[1], [0], [0], [1], [0, 0, 1, 1], [], []>} : vector<32x160xbf16>, vector<160x128xbf16>, vector<32x128xf32> -> vector<32x128xf32>
    %11 = arith.maximumf %7, %10 : vector<32x128xf32>
    %c3 = arith.constant 3 : index
    %c0_10 = arith.constant 0 : index
    %c0_11 = arith.constant 0 : index
    %12 = vector.load %arg1[%c3, %c0_10, %c0_11] : memref<4x32x160xbf16, #tpu.memory_space<vmem>>, vector<1x32x160xbf16>
    %13 = vector.shape_cast %12 : vector<1x32x160xbf16> to vector<32x160xbf16>
    %cst_12 = arith.constant dense<0.000000e+00> : vector<32x128xf32>
    %14 = tpu.matmul %13, %0, %cst_12 {dimension_numbers = #tpu.dot_dimension_numbers<[1], [0], [0], [1], [0, 0, 1, 1], [], []>} : vector<32x160xbf16>, vector<160x128xbf16>, vector<32x128xf32> -> vector<32x128xf32>
    %15 = arith.maximumf %11, %14 : vector<32x128xf32>
    %c0_13 = arith.constant 0 : index
    %c0_14 = arith.constant 0 : index
    %16 = vector.load %arg3[%c0_13, %c0_14] : memref<1x128xf32, #tpu.memory_space<vmem>>, vector<1x128xf32>
    %17 = vector.broadcast %16 : vector<1x128xf32> to vector<32x128xf32>
    %18 = arith.addf %15, %17 : vector<32x128xf32>
    %19 = math.tanh %18 : vector<32x128xf32>
    %20 = arith.truncf %19 : vector<32x128xf32> to vector<32x128xbf16>
    %c0_15 = arith.constant 0 : index
    %c0_16 = arith.constant 0 : index
    %21 = vector.load %arg4[%c0_15, %c0_16] : memref<32x128xbf16, #tpu.memory_space<vmem>>, vector<32x128xbf16>
    tpu.vector_store %arg4[%c0_15, %c0_16], %20 {strides = array<i32>} : memref<32x128xbf16, #tpu.memory_space<vmem>>, vector<32x128xbf16>,
    return
  }
  func.func @transform_0(%arg0: i32) -> (i32, i32, i32) {
    %c0_i32 = arith.constant 0 : i32
    %c0_i32_0 = arith.constant 0 : i32
    %c0_i32_1 = arith.constant 0 : i32
    return %c0_i32, %arg0, %c0_i32_0 : i32, i32, i32
  }
  func.func @transform_1(%arg0: i32) -> (i32, i32) {
    %c0_i32 = arith.constant 0 : i32
    %c0_i32_0 = arith.constant 0 : i32
    %c0_i32_1 = arith.constant 0 : i32
    return %c0_i32, %c0_i32_0 : i32, i32
  }
  func.func @transform_2(%arg0: i32) -> (i32, i32) {
    %c0_i32 = arith.constant 0 : i32
    %c0_i32_0 = arith.constant 0 : i32
    %c0_i32_1 = arith.constant 0 : i32
    return %c0_i32, %c0_i32_0 : i32, i32
  }
  func.func @transform_3(%arg0: i32) -> (i32, i32) {
    %c0_i32 = arith.constant 0 : i32
    %c0_i32_0 = arith.constant 0 : i32
    return %arg0, %c0_i32 : i32, i32
  }
}

module attributes {stable_mosaic.version = 11 : i64} {
  func.func @_fc_kernel(%arg0: i32, %arg1: memref<16x400xbf16, #tpu.memory_space<vmem>>, %arg2: memref<400x128xbf16, #tpu.memory_space<vmem>>, %arg3: memref<1x128xf32, #tpu.memory_space<vmem>>, %arg4: memref<128x128xbf16, #tpu.memory_space<vmem>>, %arg5: memref<1x128xf32, #tpu.memory_space<vmem>>, %arg6: memref<128x128xbf16, #tpu.memory_space<vmem>>, %arg7: memref<1x128xf32, #tpu.memory_space<vmem>>, %arg8: memref<16x128xf32, #tpu.memory_space<vmem>>) attributes {dimension_semantics = [#tpu.dimension_semantics<parallel>], iteration_bounds = array<i64: 1>, scalar_prefetch = 0 : i64, scratch_operands = 0 : i64, tpu.core_type = #tpu.core_type<tc>, window_params = [{transform_indices = @transform_0, window_bounds = array<i64: 16, 400>}, {pipeline_mode = #tpu.pipeline_mode<synchronous>, transform_indices = @transform_1, window_bounds = array<i64: 400, 128>}, {pipeline_mode = #tpu.pipeline_mode<synchronous>, transform_indices = @transform_2, window_bounds = array<i64: 1, 128>}, {pipeline_mode = #tpu.pipeline_mode<synchronous>, transform_indices = @transform_3, window_bounds = array<i64: 128, 128>}, {pipeline_mode = #tpu.pipeline_mode<synchronous>, transform_indices = @transform_4, window_bounds = array<i64: 1, 128>}, {pipeline_mode = #tpu.pipeline_mode<synchronous>, transform_indices = @transform_5, window_bounds = array<i64: 128, 128>}, {pipeline_mode = #tpu.pipeline_mode<synchronous>, transform_indices = @transform_6, window_bounds = array<i64: 1, 128>}, {transform_indices = @transform_7, window_bounds = array<i64: 16, 128>}]} {
    %c0 = arith.constant 0 : index
    %c0_0 = arith.constant 0 : index
    %0 = vector.load %arg1[%c0, %c0_0] : memref<16x400xbf16, #tpu.memory_space<vmem>>, vector<16x400xbf16>
    %c0_1 = arith.constant 0 : index
    %c0_2 = arith.constant 0 : index
    %1 = vector.load %arg2[%c0_1, %c0_2] : memref<400x128xbf16, #tpu.memory_space<vmem>>, vector<400x128xbf16>
    %cst = arith.constant dense<0.000000e+00> : vector<16x128xf32>
    %2 = tpu.matmul %0, %1, %cst {dimension_numbers = #tpu.dot_dimension_numbers<[1], [0], [0], [1], [0, 0, 1, 1], [], []>} : vector<16x400xbf16>, vector<400x128xbf16>, vector<16x128xf32> -> vector<16x128xf32>
    %c0_3 = arith.constant 0 : index
    %c0_4 = arith.constant 0 : index
    %3 = vector.load %arg3[%c0_3, %c0_4] : memref<1x128xf32, #tpu.memory_space<vmem>>, vector<1x128xf32>
    %4 = vector.broadcast %3 : vector<1x128xf32> to vector<16x128xf32>
    %5 = arith.addf %2, %4 : vector<16x128xf32>
    %6 = math.tanh %5 : vector<16x128xf32>
    %7 = arith.truncf %6 : vector<16x128xf32> to vector<16x128xbf16>
    %c0_5 = arith.constant 0 : index
    %c0_6 = arith.constant 0 : index
    %8 = vector.load %arg4[%c0_5, %c0_6] : memref<128x128xbf16, #tpu.memory_space<vmem>>, vector<128x128xbf16>
    %cst_7 = arith.constant dense<0.000000e+00> : vector<16x128xf32>
    %9 = tpu.matmul %7, %8, %cst_7 {dimension_numbers = #tpu.dot_dimension_numbers<[1], [0], [0], [1], [0, 0, 1, 1], [], []>} : vector<16x128xbf16>, vector<128x128xbf16>, vector<16x128xf32> -> vector<16x128xf32>
    %c0_8 = arith.constant 0 : index
    %c0_9 = arith.constant 0 : index
    %10 = vector.load %arg5[%c0_8, %c0_9] : memref<1x128xf32, #tpu.memory_space<vmem>>, vector<1x128xf32>
    %11 = vector.broadcast %10 : vector<1x128xf32> to vector<16x128xf32>
    %12 = arith.addf %9, %11 : vector<16x128xf32>
    %13 = math.tanh %12 : vector<16x128xf32>
    %14 = arith.truncf %13 : vector<16x128xf32> to vector<16x128xbf16>
    %c0_10 = arith.constant 0 : index
    %c0_11 = arith.constant 0 : index
    %15 = vector.load %arg6[%c0_10, %c0_11] : memref<128x128xbf16, #tpu.memory_space<vmem>>, vector<128x128xbf16>
    %cst_12 = arith.constant dense<0.000000e+00> : vector<16x128xf32>
    %16 = tpu.matmul %14, %15, %cst_12 {dimension_numbers = #tpu.dot_dimension_numbers<[1], [0], [0], [1], [0, 0, 1, 1], [], []>} : vector<16x128xbf16>, vector<128x128xbf16>, vector<16x128xf32> -> vector<16x128xf32>
    %c0_13 = arith.constant 0 : index
    %c0_14 = arith.constant 0 : index
    %17 = vector.load %arg7[%c0_13, %c0_14] : memref<1x128xf32, #tpu.memory_space<vmem>>, vector<1x128xf32>
    %18 = vector.broadcast %17 : vector<1x128xf32> to vector<16x128xf32>
    %19 = arith.addf %16, %18 : vector<16x128xf32>
    %c0_15 = arith.constant 0 : index
    %c0_16 = arith.constant 0 : index
    %20 = vector.load %arg8[%c0_15, %c0_16] : memref<16x128xf32, #tpu.memory_space<vmem>>, vector<16x128xf32>
    tpu.vector_store %arg8[%c0_15, %c0_16], %19 {strides = array<i32>} : memref<16x128xf32, #tpu.memory_space<vmem>>, vector<16x128xf32>,
    return
  }
  func.func @transform_0(%arg0: i32) -> (i32, i32) {
    %c0_i32 = arith.constant 0 : i32
    %c0_i32_0 = arith.constant 0 : i32
    return %arg0, %c0_i32 : i32, i32
  }
  func.func @transform_1(%arg0: i32) -> (i32, i32) {
    %c0_i32 = arith.constant 0 : i32
    %c0_i32_0 = arith.constant 0 : i32
    %c0_i32_1 = arith.constant 0 : i32
    return %c0_i32, %c0_i32_0 : i32, i32
  }
  func.func @transform_2(%arg0: i32) -> (i32, i32) {
    %c0_i32 = arith.constant 0 : i32
    %c0_i32_0 = arith.constant 0 : i32
    %c0_i32_1 = arith.constant 0 : i32
    return %c0_i32, %c0_i32_0 : i32, i32
  }
  func.func @transform_3(%arg0: i32) -> (i32, i32) {
    %c0_i32 = arith.constant 0 : i32
    %c0_i32_0 = arith.constant 0 : i32
    %c0_i32_1 = arith.constant 0 : i32
    return %c0_i32, %c0_i32_0 : i32, i32
  }
  func.func @transform_4(%arg0: i32) -> (i32, i32) {
    %c0_i32 = arith.constant 0 : i32
    %c0_i32_0 = arith.constant 0 : i32
    %c0_i32_1 = arith.constant 0 : i32
    return %c0_i32, %c0_i32_0 : i32, i32
  }
  func.func @transform_5(%arg0: i32) -> (i32, i32) {
    %c0_i32 = arith.constant 0 : i32
    %c0_i32_0 = arith.constant 0 : i32
    %c0_i32_1 = arith.constant 0 : i32
    return %c0_i32, %c0_i32_0 : i32, i32
  }
  func.func @transform_6(%arg0: i32) -> (i32, i32) {
    %c0_i32 = arith.constant 0 : i32
    %c0_i32_0 = arith.constant 0 : i32
    %c0_i32_1 = arith.constant 0 : i32
    return %c0_i32, %c0_i32_0 : i32, i32
  }
  func.func @transform_7(%arg0: i32) -> (i32, i32) {
    %c0_i32 = arith.constant 0 : i32
    %c0_i32_0 = arith.constant 0 : i32
    return %arg0, %c0_i32 : i32, i32
  }
}

</mosaic_0001>

<bundles_post_ra>
// kernel: lenet5_forward.3
= control target key start
LH: loop header
LB: loop body
LE: loop exit
PB: predicated region body
PF: predicated region fallthrough
CT: control target
= control target key end

     0   :  { %s2833_s12 = smov 0   ;;  %s2835_s13 = smov 0   ;;  %s3497_s0 = inlined_call_operand.vmem [shape: bf16[4,416,32], index: 0, kind: input, shape index: {}]   ;;  %s3498_s1 = inlined_call_operand.vmem [shape: bf16[32,128], index: 1, kind: input, shape index: {}]   ;;  %s3499_s2 = inlined_call_operand.vmem [shape: f32[1,128], index: 2, kind: input, shape index: {}]   ;;  %s3500_s3 = inlined_call_operand.vmem [shape: bf16[416,128], index: 3, kind: output, shape index: {}]  }
   0x1   :  { %s2837_s14 = smov 0  }
   0x2 LB: > { %s2045_s15 = sadd.s32 4294967295, %s2809_s14   ;;  %s2850_s16 = sadd.s32 1, %s2809_s14   ;;  %s2809_s14 = sphi %s2837_s14, %s3534_s14   ;;  %s2805_s13 = sphi %s2835_s13, %s3533_s13   ;;  %s2801_s12 = sphi %s2833_s12, %s3532_s12  }
   0x3   : > { %s17_s17 = ssub.s32 %s2809_s14, %s2850_s16  ;;  %s20_s18 = sadd.s32 1, %s2805_s13 }
   0x4   : > { %p18_p0 = scmp.eq.s32.totalorder %s17_s17, 0  ;;  %p27_p1 = scmp.ne.s32.totalorder %s2805_s13, %s2801_s12 }
   0x5   : > { %p28_p2 = scmp.eq.s32.totalorder %s2809_s14, 0  ;;  %p2048_p4 = scmp.ge.s32.totalorder %s2809_s14, 2 }
   0x6   : > { %s2859_s19 = scalar_select %p18_p0, %s2805_s13, %s20_s18  }
   0x7   : > { %p29_p3 = por %p28_p2, %p27_p1  ;;  %127 = sbr.rel (%p2048_p4) target bundleno = 45 (0x2d), region = 24 }
   0xe   : > { %130 = sbr.rel (!%p29_p3) target bundleno = 45 (0x2d), region = 28  ;;  %s132_s20 = sand.u32 (%p29_p3), 1, %s2805_s13  }
   0xf   : > { %s2265_s21 = smul.u32 (%p29_p3), 104, %s2809_s14 }
  0x10   : > { %s2653_s22 = smul.u32 (%p29_p3), 416, %s132_s20 }
  0x11   : > { %s2867_s25 = scalar_lea.vmem (%p29_p3), %s3497_s0, %s2265_s21 }
  0x12   : > { %v153_v0 = vld [vmem:[%s2867_s25] sm:$0xff] (%p29_p3)   ;;  %v157_v1 = vld [vmem:[%s2867_s25 + $0x8] sm:$0xff] (%p29_p3)   ;;  %v161_v2 = vld [vmem:[%s2867_s25 + $0x10] sm:$0xff] (%p29_p3)   ;;  %s2872_s26 = scalar_lea.vmem (%p29_p3), [#allocation2], %s2653_s22 }
  0x13   : > { %154 = vst [vmem:[%s2872_s26] sm:$0xff] (%p29_p3), %v153_v0   ;;  %158 = vst [vmem:[%s2872_s26 + $0x8] sm:$0xff] (%p29_p3), %v157_v1   ;;  %v165_v3 = vld [vmem:[%s2867_s25 + $0x18] sm:$0xff] (%p29_p3)   ;;  %v169_v4 = vld [vmem:[%s2867_s25 + $0x20] sm:$0xff] (%p29_p3)  }
  0x14   : > { %162 = vst [vmem:[%s2872_s26 + $0x10] sm:$0xff] (%p29_p3), %v161_v2   ;;  %v173_v5 = vld [vmem:[%s2867_s25 + $0x28] sm:$0xff] (%p29_p3)   ;;  %166 = vst [vmem:[%s2872_s26 + $0x18] sm:$0xff] (%p29_p3), %v165_v3   ;;  %v177_v6 = vld [vmem:[%s2867_s25 + $0x30] sm:$0xff] (%p29_p3)  }
  0x15   : > { %170 = vst [vmem:[%s2872_s26 + $0x20] sm:$0xff] %v169_v4   ;;  %174 = vst [vmem:[%s2872_s26 + $0x28] sm:$0xff] %v173_v5   ;;  %v181_v7 = vld [vmem:[%s2867_s25 + $0x38] sm:$0xff]   ;;  %v185_v8 = vld [vmem:[%s2867_s25 + $0x40] sm:$0xff]  }
  0x16   : > { %178 = vst [vmem:[%s2872_s26 + $0x30] sm:$0xff] %v177_v6   ;;  %182 = vst [vmem:[%s2872_s26 + $0x38] sm:$0xff] %v181_v7   ;;  %v189_v9 = vld [vmem:[%s2867_s25 + $0x48] sm:$0xff]   ;;  %v193_v10 = vld [vmem:[%s2867_s25 + $0x50] sm:$0xff]  }
  0x17   : > { %186 = vst [vmem:[%s2872_s26 + $0x40] sm:$0xff] %v185_v8   ;;  %v197_v11 = vld [vmem:[%s2867_s25 + $0x58] sm:$0xff]   ;;  %190 = vst [vmem:[%s2872_s26 + $0x48] sm:$0xff] %v189_v9   ;;  %v201_v12 = vld [vmem:[%s2867_s25 + $0x60] sm:$0xff]  }
  0x18   : > { %194 = vst [vmem:[%s2872_s26 + $0x50] sm:$0xff] %v193_v10   ;;  %198 = vst [vmem:[%s2872_s26 + $0x58] sm:$0xff] %v197_v11   ;;  %v205_v13 = vld [vmem:[%s2867_s25 + $0xd0] sm:$0xff]   ;;  %v209_v14 = vld [vmem:[%s2867_s25 + $0xd8] sm:$0xff]  }
  0x19   : > { %202 = vst [vmem:[%s2872_s26 + $0x60] sm:$0xff] %v201_v12   ;;  %206 = vst [vmem:[%s2872_s26 + $0x68] sm:$0xff] %v205_v13   ;;  %v213_v15 = vld [vmem:[%s2867_s25 + $0xe0] sm:$0xff]   ;;  %v217_v16 = vld [vmem:[%s2867_s25 + $0xe8] sm:$0xff]  }
  0x1a   : > { %210 = vst [vmem:[%s2872_s26 + $0x70] sm:$0xff] %v209_v14   ;;  %v221_v17 = vld [vmem:[%s2867_s25 + $0xf0] sm:$0xff]   ;;  %214 = vst [vmem:[%s2872_s26 + $0x78] sm:$0xff] %v213_v15   ;;  %v225_v18 = vld [vmem:[%s2867_s25 + $0xf8] sm:$0xff]  }
  0x1b   : > { %218 = vst [vmem:[%s2872_s26 + $0x80] sm:$0xff] %v217_v16   ;;  %222 = vst [vmem:[%s2872_s26 + $0x88] sm:$0xff] %v221_v17   ;;  %v229_v19 = vld [vmem:[%s2867_s25 + $0x100] sm:$0xff]   ;;  %v233_v20 = vld [vmem:[%s2867_s25 + $0x108] sm:$0xff]  }
  0x1c   : > { %226 = vst [vmem:[%s2872_s26 + $0x90] sm:$0xff] %v225_v18   ;;  %230 = vst [vmem:[%s2872_s26 + $0x98] sm:$0xff] %v229_v19   ;;  %v237_v21 = vld [vmem:[%s2867_s25 + $0x110] sm:$0xff]   ;;  %v241_v22 = vld [vmem:[%s2867_s25 + $0x118] sm:$0xff]  }
  0x1d   : > { %234 = vst [vmem:[%s2872_s26 + $0xa0] sm:$0xff] %v233_v20   ;;  %v245_v23 = vld [vmem:[%s2867_s25 + $0x120] sm:$0xff]   ;;  %238 = vst [vmem:[%s2872_s26 + $0xa8] sm:$0xff] %v237_v21   ;;  %v249_v24 = vld [vmem:[%s2867_s25 + $0x128] sm:$0xff]  }
  0x1e   : > { %242 = vst [vmem:[%s2872_s26 + $0xb0] sm:$0xff] %v241_v22   ;;  %246 = vst [vmem:[%s2872_s26 + $0xb8] sm:$0xff] %v245_v23   ;;  %v253_v25 = vld [vmem:[%s2867_s25 + $0x130] sm:$0xff]   ;;  %v257_v26 = vld [vmem:[%s2867_s25 + $0x1a0] sm:$0xff]  }
  0x1f   : > { %250 = vst [vmem:[%s2872_s26 + $0xc0] sm:$0xff] %v249_v24   ;;  %254 = vst [vmem:[%s2872_s26 + $0xc8] sm:$0xff] %v253_v25   ;;  %v261_v27 = vld [vmem:[%s2867_s25 + $0x1a8] sm:$0xff]   ;;  %v265_v28 = vld [vmem:[%s2867_s25 + $0x1b0] sm:$0xff]  }
  0x20   : > { %258 = vst [vmem:[%s2872_s26 + $0xd0] sm:$0xff] %v257_v26   ;;  %v269_v29 = vld [vmem:[%s2867_s25 + $0x1b8] sm:$0xff]   ;;  %262 = vst [vmem:[%s2872_s26 + $0xd8] sm:$0xff] %v261_v27   ;;  %v273_v30 = vld [vmem:[%s2867_s25 + $0x1c0] sm:$0xff]  }
  0x21   : > { %266 = vst [vmem:[%s2872_s26 + $0xe0] sm:$0xff] %v265_v28   ;;  %270 = vst [vmem:[%s2872_s26 + $0xe8] sm:$0xff] %v269_v29   ;;  %v277_v31 = vld [vmem:[%s2867_s25 + $0x1c8] sm:$0xff]   ;;  %v281_v32 = vld [vmem:[%s2867_s25 + $0x1d0] sm:$0xff]  }
  0x22   : > { %274 = vst [vmem:[%s2872_s26 + $0xf0] sm:$0xff] %v273_v30   ;;  %278 = vst [vmem:[%s2872_s26 + $0xf8] sm:$0xff] %v277_v31   ;;  %v285_v33 = vld [vmem:[%s2867_s25 + $0x1d8] sm:$0xff]   ;;  %v289_v34 = vld [vmem:[%s2867_s25 + $0x1e0] sm:$0xff]  }
  0x23   : > { %282 = vst [vmem:[%s2872_s26 + $0x100] sm:$0xff] %v281_v32   ;;  %v293_v35 = vld [vmem:[%s2867_s25 + $0x1e8] sm:$0xff]   ;;  %286 = vst [vmem:[%s2872_s26 + $0x108] sm:$0xff] %v285_v33   ;;  %v297_v36 = vld [vmem:[%s2867_s25 + $0x1f0] sm:$0xff]  }
  0x24   : > { %290 = vst [vmem:[%s2872_s26 + $0x110] sm:$0xff] %v289_v34   ;;  %294 = vst [vmem:[%s2872_s26 + $0x118] sm:$0xff] %v293_v35   ;;  %v301_v37 = vld [vmem:[%s2867_s25 + $0x1f8] sm:$0xff]   ;;  %v305_v38 = vld [vmem:[%s2867_s25 + $0x200] sm:$0xff]  }
  0x25   : > { %298 = vst [vmem:[%s2872_s26 + $0x120] sm:$0xff] %v297_v36   ;;  %302 = vst [vmem:[%s2872_s26 + $0x128] sm:$0xff] %v301_v37   ;;  %v309_v39 = vld [vmem:[%s2867_s25 + $0x270] sm:$0xff]   ;;  %v313_v40 = vld [vmem:[%s2867_s25 + $0x278] sm:$0xff]  }
  0x26   : > { %306 = vst [vmem:[%s2872_s26 + $0x130] sm:$0xff] %v305_v38   ;;  %v317_v41 = vld [vmem:[%s2867_s25 + $0x280] sm:$0xff]   ;;  %310 = vst [vmem:[%s2872_s26 + $0x138] sm:$0xff] %v309_v39   ;;  %v321_v42 = vld [vmem:[%s2867_s25 + $0x288] sm:$0xff]  }
  0x27   : > { %314 = vst [vmem:[%s2872_s26 + $0x140] sm:$0xff] %v313_v40   ;;  %318 = vst [vmem:[%s2872_s26 + $0x148] sm:$0xff] %v317_v41   ;;  %v325_v43 = vld [vmem:[%s2867_s25 + $0x290] sm:$0xff]   ;;  %v329_v44 = vld [vmem:[%s2867_s25 + $0x298] sm:$0xff]  }
  0x28   : > { %322 = vst [vmem:[%s2872_s26 + $0x150] sm:$0xff] %v321_v42   ;;  %326 = vst [vmem:[%s2872_s26 + $0x158] sm:$0xff] %v325_v43   ;;  %v333_v45 = vld [vmem:[%s2867_s25 + $0x2a0] sm:$0xff]   ;;  %v337_v46 = vld [vmem:[%s2867_s25 + $0x2a8] sm:$0xff]  }
  0x29   : > { %330 = vst [vmem:[%s2872_s26 + $0x160] sm:$0xff] %v329_v44   ;;  %v341_v47 = vld [vmem:[%s2867_s25 + $0x2b0] sm:$0xff]   ;;  %334 = vst [vmem:[%s2872_s26 + $0x168] sm:$0xff] %v333_v45   ;;  %v345_v48 = vld [vmem:[%s2867_s25 + $0x2b8] sm:$0xff]  }
  0x2a   : > { %338 = vst [vmem:[%s2872_s26 + $0x170] sm:$0xff] %v337_v46   ;;  %342 = vst [vmem:[%s2872_s26 + $0x178] sm:$0xff] %v341_v47   ;;  %v349_v49 = vld [vmem:[%s2867_s25 + $0x2c0] sm:$0xff]   ;;  %v353_v50 = vld [vmem:[%s2867_s25 + $0x2c8] sm:$0xff]  }
  0x2b   : > { %346 = vst [vmem:[%s2872_s26 + $0x180] sm:$0xff] %v345_v48   ;;  %350 = vst [vmem:[%s2872_s26 + $0x188] sm:$0xff] %v349_v49   ;;  %v357_v51 = vld [vmem:[%s2867_s25 + $0x2d0] sm:$0xff]  }
  0x2c   : > { %354 = vst [vmem:[%s2872_s26 + $0x190] sm:$0xff] %v353_v50   ;;  %358 = vst [vmem:[%s2872_s26 + $0x198] sm:$0xff] %v357_v51  }
  0x2d PF: > { %p2050_p5 = scmp.ge.s32.totalorder %s2809_s14, 1  ;;  %p590_p6 = scmp.lt.s32.totalorder %s2809_s14, 3 }
  0x2f   : > { %p591_p7 = pnand %p2050_p5, %p590_p6 }
  0x31   : > { %594 = sbr.rel (%p591_p7) target bundleno = 499 (0x1f3), region = 69 }
  0x38   : > { %v2681_v52 = vld [vmem:[%s3498_s1] sm:$0xff]   ;;  %v2811_v53 = vmov 0.0   ;;  %v2682_v54 = vld [vmem:[%s3498_s1 + $0x8] sm:$0xff]   ;;  %s597_s4 = sand.u32 1, %s2801_s12   ;;  %vm2812_vm0 = vmmov 0   ;;  %vm735_vm1 = vcmask 261120  }
  0x39   : > { %2429 = vmatprep.subr.bf16.mxu0 %v2811_v53  ;;  %2485 = vmatprep.subr.bf16.mxu1 %v2811_v53  ;;  %s2654_s5 = smul.u32 416, %s597_s4 }
  0x3a   : > { %2430 = vmatpush3.bf16.msra.mxu0 %v2681_v52  ;;  %2486 = vmatpush3.bf16.msra.mxu1 %v2681_v52  ;;  %s621_s9 = smul.u32 26, %s2045_s15 }
  0x3b   : > { %2431 = vmatprep.subr.bf16.mxu0 %v2811_v53  ;;  %2487 = vmatprep.subr.bf16.mxu1 %v2811_v53  ;;  %s2992_s6 = scalar_lea.vmem [#allocation2], %s2654_s5 }
  0x3c   : > { %2433 = vmatprep.mubr.msk.bf16.mxu0 %vm2812_vm0, %v2811_v53  ;;  %2489 = vmatprep.mubr.msk.bf16.mxu1 %vm2812_vm0, %v2811_v53  ;;  %v2683_v55 = vld [vmem:[%s2992_s6] sm:$0xff]   ;;  %v2684_v56 = vld [vmem:[%s2992_s6 + $0x68] sm:$0xff]   ;;  %v2686_v58 = vld [vmem:[%s2992_s6 + $0x70] sm:$0xff]   ;;  %p622_p8 = scmp.lt.s32.totalorder %s621_s9, 51 }
  0x3d   : > { %v2685_v57 = vld [vmem:[%s2992_s6 + $0x8] sm:$0xff]   ;;  %v2687_v59 = vld [vmem:[%s2992_s6 + $0x10] sm:$0xff]   ;;  %v2688_v60 = vld [vmem:[%s2992_s6 + $0x78] sm:$0xff]  }
  0x3e   : > { %2432 = vmatpush3.bf16.msra.mxu0 %v2682_v54  ;;  %2488 = vmatpush3.bf16.msra.mxu1 %v2682_v54  ;;  %v2689_v61 = vld [vmem:[%s2992_s6 + $0x18] sm:$0xff]   ;;  %v2690_v62 = vld [vmem:[%s2992_s6 + $0x80] sm:$0xff]   ;;  %v2692_v0 = vld [vmem:[%s2992_s6 + $0x88] sm:$0xff]   ;;  %s3536_s9 = smov (!%p622_p8, %s621_s9), 51 }
  0x3f   : > { %2541 = vmatprep.subr.bf16.mxu0 %v2811_v53  ;;  %2597 = vmatprep.subr.bf16.mxu1 %v2811_v53  ;;  %v2691_v63 = vld [vmem:[%s2992_s6 + $0x20] sm:$0xff]   ;;  %v2693_v1 = vld [vmem:[%s2992_s6 + $0x28] sm:$0xff]   ;;  %v2694_v2 = vld [vmem:[%s2992_s6 + $0x90] sm:$0xff]   ;;  %s2051_s10 = sshll.u32 %s3536_s9, 2 }
  0x40   : > { %v2695_v3 = vld [vmem:[%s2992_s6 + $0x30] sm:$0xff]   ;;  %v2696_v4 = vld [vmem:[%s2992_s6 + $0x98] sm:$0xff]   ;;  %v2698_v6 = vld [vmem:[%s2992_s6 + $0xa0] sm:$0xff]   ;;  %s3387_s14 = scalar_lea.vmem %s3500_s3, %s2051_s10 }
  0x41   : > { %2434 = vmatmul.mubr.msk.bf16.vlgmr.msra.gmra.mrb[0].mxu0 %vm735_vm1, %v2683_v55  ;;  %2490 = vmatmul.mubr.msk.bf16.vlgmr.msra.gmra.mrb[0].mxu1 %vm735_vm1, %v2684_v56  ;;  %v2697_v5 = vld [vmem:[%s2992_s6 + $0x38] sm:$0xff]   ;;  %v2699_v7 = vld [vmem:[%s2992_s6 + $0x40] sm:$0xff]   ;;  %v2700_v8 = vld [vmem:[%s2992_s6 + $0xa8] sm:$0xff]  }
  0x42   : > { %2542 = vmatpush3.bf16.msra.mxu0 %v2681_v52  ;;  %2598 = vmatpush3.bf16.msra.mxu1 %v2681_v52  ;;  %v2701_v9 = vld [vmem:[%s2992_s6 + $0x48] sm:$0xff]   ;;  %v2702_v10 = vld [vmem:[%s2992_s6 + $0xb0] sm:$0xff]   ;;  %v2704_v12 = vld [vmem:[%s2992_s6 + $0xb8] sm:$0xff]  }
  0x43   : > { %2437 = vmatprep.mubr.msk.bf16.mxu0 %vm2812_vm0, %v2811_v53  ;;  %2493 = vmatprep.mubr.msk.bf16.mxu1 %vm2812_vm0, %v2811_v53  ;;  %v2703_v11 = vld [vmem:[%s2992_s6 + $0x50] sm:$0xff]   ;;  %v2705_v13 = vld [vmem:[%s2992_s6 + $0x58] sm:$0xff]   ;;  %v2706_v14 = vld [vmem:[%s2992_s6 + $0xc0] sm:$0xff]  }
  0x44   : > { %2543 = vmatprep.subr.bf16.mxu0 %v2811_v53  ;;  %2599 = vmatprep.subr.bf16.mxu1 %v2811_v53  ;;  %v2707_v15 = vld [vmem:[%s2992_s6 + $0x60] sm:$0xff]   ;;  %v2708_v16 = vld [vmem:[%s2992_s6 + $0xc8] sm:$0xff]   ;;  %v2709_v17 = vld [vmem:[%s2992_s6 + $0xd0] sm:$0xff]  }
  0x45   : > { %v2710_v18 = vld [vmem:[%s2992_s6 + $0x138] sm:$0xff]   ;;  %v2712_v20 = vld [vmem:[%s2992_s6 + $0x140] sm:$0xff]   ;;  %v2714_v22 = vld [vmem:[%s2992_s6 + $0x148] sm:$0xff]  }
  0x46   : > { %2544 = vmatpush3.bf16.msra.mxu0 %v2682_v54  ;;  %2600 = vmatpush3.bf16.msra.mxu1 %v2682_v54  ;;  %v2711_v19 = vld [vmem:[%s2992_s6 + $0xd8] sm:$0xff]   ;;  %v2713_v21 = vld [vmem:[%s2992_s6 + $0xe0] sm:$0xff]   ;;  %v2715_v23 = vld [vmem:[%s2992_s6 + $0xe8] sm:$0xff]  }
  0x47   : > { %v2716_v24 = vld [vmem:[%s2992_s6 + $0x150] sm:$0xff]   ;;  %v2718_v26 = vld [vmem:[%s2992_s6 + $0x158] sm:$0xff]   ;;  %v2720_v28 = vld [vmem:[%s2992_s6 + $0x160] sm:$0xff]  }
  0x48   : > { %v2717_v25 = vld [vmem:[%s2992_s6 + $0xf0] sm:$0xff]   ;;  %v2719_v27 = vld [vmem:[%s2992_s6 + $0xf8] sm:$0xff]   ;;  %v2721_v29 = vld [vmem:[%s2992_s6 + $0x100] sm:$0xff]  }
  0x49   : > { %2438 = vmatmul.mubr.msk.bf16.gmra.mrb[4].mxu0 %vm735_vm1, %v2685_v57  ;;  %2494 = vmatmul.mubr.msk.bf16.gmra.mrb[4].mxu1 %vm735_vm1, %v2686_v58  ;;  %v2722_v30 = vld [vmem:[%s2992_s6 + $0x168] sm:$0xff]   ;;  %v2724_v32 = vld [vmem:[%s2992_s6 + $0x170] sm:$0xff]   ;;  %v2726_v34 = vld [vmem:[%s2992_s6 + $0x178] sm:$0xff]  }
  0x4a   : > { %2441 = vmatprep.mubr.msk.bf16.mxu0 %vm2812_vm0, %v2811_v53  ;;  %2497 = vmatprep.mubr.msk.bf16.mxu1 %vm2812_vm0, %v2811_v53  ;;  %v2723_v31 = vld [vmem:[%s2992_s6 + $0x108] sm:$0xff]   ;;  %v2725_v33 = vld [vmem:[%s2992_s6 + $0x110] sm:$0xff]   ;;  %v2727_v35 = vld [vmem:[%s2992_s6 + $0x118] sm:$0xff]  }
  0x4b   : > { %v2728_v36 = vld [vmem:[%s2992_s6 + $0x180] sm:$0xff]   ;;  %v2730_v38 = vld [vmem:[%s2992_s6 + $0x188] sm:$0xff]   ;;  %v2732_v40 = vld [vmem:[%s2992_s6 + $0x190] sm:$0xff]  }
  0x4c   : > { %v2729_v37 = vld [vmem:[%s2992_s6 + $0x120] sm:$0xff]   ;;  %v2731_v39 = vld [vmem:[%s2992_s6 + $0x128] sm:$0xff]   ;;  %v2733_v41 = vld [vmem:[%s2992_s6 + $0x130] sm:$0xff]  }
  0x4d   : > { %v2734_v42 = vld [vmem:[%s2992_s6 + $0x198] sm:$0xff]  }
  0x51   : > { %2442 = vmatmul.mubr.msk.bf16.gmra.mrb[8].mxu0 %vm735_vm1, %v2687_v59  ;;  %2498 = vmatmul.mubr.msk.bf16.gmra.mrb[8].mxu1 %vm735_vm1, %v2688_v60 }
  0x52   : > { %2445 = vmatprep.mubr.msk.bf16.mxu0 %vm2812_vm0, %v2811_v53  ;;  %2501 = vmatprep.mubr.msk.bf16.mxu1 %vm2812_vm0, %v2811_v53 }
  0x59   : > { %2446 = vmatmul.mubr.msk.bf16.gmra.mrb[12].mxu0 %vm735_vm1, %v2689_v61  ;;  %2502 = vmatmul.mubr.msk.bf16.gmra.mrb[12].mxu1 %vm735_vm1, %v2690_v62 }
  0x5a   : > { %2449 = vmatprep.mubr.msk.bf16.mxu0 %vm2812_vm0, %v2811_v53  ;;  %2505 = vmatprep.mubr.msk.bf16.mxu1 %vm2812_vm0, %v2811_v53 }
  0x61   : > { %2450 = vmatmul.mubr.msk.bf16.gmra.mrb[16].mxu0 %vm735_vm1, %v2691_v63  ;;  %2506 = vmatmul.mubr.msk.bf16.gmra.mrb[16].mxu1 %vm735_vm1, %v2692_v0 }
  0x62   : > { %2453 = vmatprep.mubr.msk.bf16.mxu0 %vm2812_vm0, %v2811_v53  ;;  %2509 = vmatprep.mubr.msk.bf16.mxu1 %vm2812_vm0, %v2811_v53 }
  0x69   : > { %2454 = vmatmul.mubr.msk.bf16.gmra.mrb[20].mxu0 %vm735_vm1, %v2693_v1  ;;  %2510 = vmatmul.mubr.msk.bf16.gmra.mrb[20].mxu1 %vm735_vm1, %v2694_v2 }
  0x6a   : > { %2457 = vmatprep.mubr.msk.bf16.mxu0 %vm2812_vm0, %v2811_v53  ;;  %2513 = vmatprep.mubr.msk.bf16.mxu1 %vm2812_vm0, %v2811_v53 }
  0x71   : > { %2458 = vmatmul.mubr.msk.bf16.gmra.mrb[24].mxu0 %vm735_vm1, %v2695_v3  ;;  %2514 = vmatmul.mubr.msk.bf16.gmra.mrb[24].mxu1 %vm735_vm1, %v2696_v4 }
  0x72   : > { %2461 = vmatprep.mubr.msk.bf16.mxu0 %vm2812_vm0, %v2811_v53  ;;  %2517 = vmatprep.mubr.msk.bf16.mxu1 %vm2812_vm0, %v2811_v53 }
  0x79   : > { %2462 = vmatmul.mubr.msk.bf16.gmra.mrb[28].mxu0 %vm735_vm1, %v2697_v5  ;;  %2518 = vmatmul.mubr.msk.bf16.gmra.mrb[28].mxu1 %vm735_vm1, %v2698_v6 }
  0x7a   : > { %2465 = vmatprep.mubr.msk.bf16.mxu0 %vm2812_vm0, %v2811_v53  ;;  %2521 = vmatprep.mubr.msk.bf16.mxu1 %vm2812_vm0, %v2811_v53 }
  0x81   : > { %2466 = vmatmul.mubr.msk.bf16.gmra.mrb[32].mxu0 %vm735_vm1, %v2699_v7  ;;  %2522 = vmatmul.mubr.msk.bf16.gmra.mrb[32].mxu1 %vm735_vm1, %v2700_v8 }
  0x82   : > { %2469 = vmatprep.mubr.msk.bf16.mxu0 %vm2812_vm0, %v2811_v53  ;;  %2525 = vmatprep.mubr.msk.bf16.mxu1 %vm2812_vm0, %v2811_v53 }
  0x89   : > { %2470 = vmatmul.mubr.msk.bf16.gmra.mrb[36].mxu0 %vm735_vm1, %v2701_v9  ;;  %2526 = vmatmul.mubr.msk.bf16.gmra.mrb[36].mxu1 %vm735_vm1, %v2702_v10 }
  0x8a   : > { %2473 = vmatprep.mubr.msk.bf16.mxu0 %vm2812_vm0, %v2811_v53  ;;  %2529 = vmatprep.mubr.msk.bf16.mxu1 %vm2812_vm0, %v2811_v53 }
  0x91   : > { %2474 = vmatmul.mubr.msk.bf16.gmra.mrb[40].mxu0 %vm735_vm1, %v2703_v11  ;;  %2530 = vmatmul.mubr.msk.bf16.gmra.mrb[40].mxu1 %vm735_vm1, %v2704_v12 }
  0x92   : > { %2477 = vmatprep.mubr.msk.bf16.mxu0 %vm2812_vm0, %v2811_v53  ;;  %2533 = vmatprep.mubr.msk.bf16.mxu1 %vm2812_vm0, %v2811_v53 }
  0x99   : > { %2478 = vmatmul.mubr.msk.bf16.gmra.mrb[44].mxu0 %vm735_vm1, %v2705_v13  ;;  %2534 = vmatmul.mubr.msk.bf16.gmra.mrb[44].mxu1 %vm735_vm1, %v2706_v14 }
  0x9a   : > { %2481 = vmatprep.mubr.msk.bf16.mxu0 %vm2812_vm0, %v2811_v53  ;;  %2537 = vmatprep.mubr.msk.bf16.mxu1 %vm2812_vm0, %v2811_v53 }
  0xa1   : > { %2482 = vmatmul.mubr.msk.bf16.gmra.mrb[48].mxu0 %vm735_vm1, %v2707_v15  ;;  %2538 = vmatmul.mubr.msk.bf16.gmra.mrb[48].mxu1 %vm735_vm1, %v2708_v16 }
  0xa2   : > { %2545 = vmatprep.mubr.msk.bf16.mxu0 %vm2812_vm0, %v2811_v53  ;;  %2601 = vmatprep.mubr.msk.bf16.mxu1 %vm2812_vm0, %v2811_v53 }
  0xa9   : > { %2546 = vmatmul.mubr.msk.bf16.vlgmr.msra.gmra.mrb[52].mxu0 %vm735_vm1, %v2709_v17  ;;  %2602 = vmatmul.mubr.msk.bf16.vlgmr.msra.gmra.mrb[52].mxu1 %vm735_vm1, %v2710_v18 }
  0xaa   : > { %2549 = vmatprep.mubr.msk.bf16.mxu0 %vm2812_vm0, %v2811_v53  ;;  %2605 = vmatprep.mubr.msk.bf16.mxu1 %vm2812_vm0, %v2811_v53 }
  0xb1   : > { %2550 = vmatmul.mubr.msk.bf16.gmra.mrb[56].mxu0 %vm735_vm1, %v2711_v19  ;;  %2606 = vmatmul.mubr.msk.bf16.gmra.mrb[56].mxu1 %vm735_vm1, %v2712_v20 }
  0xb2   : > { %2553 = vmatprep.mubr.msk.bf16.mxu0 %vm2812_vm0, %v2811_v53  ;;  %2609 = vmatprep.mubr.msk.bf16.mxu1 %vm2812_vm0, %v2811_v53 }
  0xb9   : > { %2554 = vmatmul.mubr.msk.bf16.gmra.mrb[60].mxu0 %vm735_vm1, %v2713_v21  ;;  %2610 = vmatmul.mubr.msk.bf16.gmra.mrb[60].mxu1 %vm735_vm1, %v2714_v22 }
  0xba   : > { %2557 = vmatprep.mubr.msk.bf16.mxu0 %vm2812_vm0, %v2811_v53  ;;  %2613 = vmatprep.mubr.msk.bf16.mxu1 %vm2812_vm0, %v2811_v53 }
  0xc1   : > { %2558 = vmatmul.mubr.msk.bf16.gmra.mrb[64].mxu0 %vm735_vm1, %v2715_v23  ;;  %2614 = vmatmul.mubr.msk.bf16.gmra.mrb[64].mxu1 %vm735_vm1, %v2716_v24 }
  0xc2   : > { %2561 = vmatprep.mubr.msk.bf16.mxu0 %vm2812_vm0, %v2811_v53  ;;  %2617 = vmatprep.mubr.msk.bf16.mxu1 %vm2812_vm0, %v2811_v53 }
  0xc9   : > { %2562 = vmatmul.mubr.msk.bf16.gmra.mrb[68].mxu0 %vm735_vm1, %v2717_v25  ;;  %2618 = vmatmul.mubr.msk.bf16.gmra.mrb[68].mxu1 %vm735_vm1, %v2718_v26 }
  0xca   : > { %2565 = vmatprep.mubr.msk.bf16.mxu0 %vm2812_vm0, %v2811_v53  ;;  %2621 = vmatprep.mubr.msk.bf16.mxu1 %vm2812_vm0, %v2811_v53 }
  0xd1   : > { %2566 = vmatmul.mubr.msk.bf16.gmra.mrb[72].mxu0 %vm735_vm1, %v2719_v27  ;;  %2622 = vmatmul.mubr.msk.bf16.gmra.mrb[72].mxu1 %vm735_vm1, %v2720_v28 }
  0xd2   : > { %2569 = vmatprep.mubr.msk.bf16.mxu0 %vm2812_vm0, %v2811_v53  ;;  %2625 = vmatprep.mubr.msk.bf16.mxu1 %vm2812_vm0, %v2811_v53 }
  0xd9   : > { %2570 = vmatmul.mubr.msk.bf16.gmra.mrb[76].mxu0 %vm735_vm1, %v2721_v29  ;;  %2626 = vmatmul.mubr.msk.bf16.gmra.mrb[76].mxu1 %vm735_vm1, %v2722_v30 }
  0xda   : > { %2573 = vmatprep.mubr.msk.bf16.mxu0 %vm2812_vm0, %v2811_v53  ;;  %2629 = vmatprep.mubr.msk.bf16.mxu1 %vm2812_vm0, %v2811_v53 }
  0xe1   : > { %2574 = vmatmul.mubr.msk.bf16.gmra.mrb[80].mxu0 %vm735_vm1, %v2723_v31  ;;  %2630 = vmatmul.mubr.msk.bf16.gmra.mrb[80].mxu1 %vm735_vm1, %v2724_v32 }
  0xe2   : > { %2577 = vmatprep.mubr.msk.bf16.mxu0 %vm2812_vm0, %v2811_v53  ;;  %2633 = vmatprep.mubr.msk.bf16.mxu1 %vm2812_vm0, %v2811_v53 }
  0xe9   : > { %2578 = vmatmul.mubr.msk.bf16.gmra.mrb[84].mxu0 %vm735_vm1, %v2725_v33  ;;  %2634 = vmatmul.mubr.msk.bf16.gmra.mrb[84].mxu1 %vm735_vm1, %v2726_v34 }
  0xea   : > { %2581 = vmatprep.mubr.msk.bf16.mxu0 %vm2812_vm0, %v2811_v53  ;;  %2637 = vmatprep.mubr.msk.bf16.mxu1 %vm2812_vm0, %v2811_v53 }
  0xf1   : > { %2582 = vmatmul.mubr.msk.bf16.gmra.mrb[88].mxu0 %vm735_vm1, %v2727_v35  ;;  %2638 = vmatmul.mubr.msk.bf16.gmra.mrb[88].mxu1 %vm735_vm1, %v2728_v36 }
  0xf2   : > { %2585 = vmatprep.mubr.msk.bf16.mxu0 %vm2812_vm0, %v2811_v53  ;;  %2641 = vmatprep.mubr.msk.bf16.mxu1 %vm2812_vm0, %v2811_v53 }
  0xf9   : > { %2586 = vmatmul.mubr.msk.bf16.gmra.mrb[92].mxu0 %vm735_vm1, %v2729_v37  ;;  %2642 = vmatmul.mubr.msk.bf16.gmra.mrb[92].mxu1 %vm735_vm1, %v2730_v38 }
  0xfa   : > { %2589 = vmatprep.mubr.msk.bf16.mxu0 %vm2812_vm0, %v2811_v53  ;;  %2645 = vmatprep.mubr.msk.bf16.mxu1 %vm2812_vm0, %v2811_v53 }
 0x101   : > { %2590 = vmatmul.mubr.msk.bf16.gmra.mrb[96].mxu0 %vm735_vm1, %v2731_v39  ;;  %2646 = vmatmul.mubr.msk.bf16.gmra.mrb[96].mxu1 %vm735_vm1, %v2732_v40 }
 0x102   : > { %2593 = vmatprep.mubr.msk.bf16.mxu0 %vm2812_vm0, %v2811_v53  ;;  %2649 = vmatprep.mubr.msk.bf16.mxu1 %vm2812_vm0, %v2811_v53 }
 0x109   : > { %2594 = vmatmul.mubr.msk.bf16.gmra.mrb[100].mxu0 %vm735_vm1, %v2733_v41  ;;  %2650 = vmatmul.mubr.msk.bf16.gmra.mrb[100].mxu1 %vm735_vm1, %v2734_v42 }
 0x114   : > { %v3202_v43 = vpop.f32.mrb[0].mxu0  ;;  %v3204_v44 = vpop.f32.mrb[0].mxu1 }
 0x115   : > { %v1180_v45 = vmax.f32 %v3202_v43, %v3204_v44  ;;  %v2435_v46 = vpop.f32.mrb[1].mxu0  ;;  %v2491_v47 = vpop.f32.mrb[1].mxu1 }
 0x116   : > { %v3208_v48 = vpop.f32.mrb[2].mxu0  ;;  %v3210_v49 = vpop.f32.mrb[2].mxu1 }
 0x117   : > { %v2436_v51 = vpop.f32.mrb[3].mxu0  ;;  %v2492_v52 = vpop.f32.mrb[3].mxu1 }
 0x11c   : > { %v3214_v53 = vpop.f32.mrb[4].mxu0  ;;  %v3216_v54 = vpop.f32.mrb[4].mxu1 }
 0x11d   : > { %v2439_v56 = vpop.f32.mrb[5].mxu0  ;;  %v2495_v57 = vpop.f32.mrb[5].mxu1 }
 0x11e   : > { %v3220_v58 = vpop.f32.mrb[6].mxu0  ;;  %v3222_v59 = vpop.f32.mrb[6].mxu1 }
 0x11f   : > { %v2440_v61 = vpop.f32.mrb[7].mxu0  ;;  %v2496_v62 = vpop.f32.mrb[7].mxu1 }
 0x124   : > { %v3226_v63 = vpop.f32.mrb[8].mxu0  ;;  %v3228_v0 = vpop.f32.mrb[8].mxu1 }
 0x125   : > { %v2443_v2 = vpop.f32.mrb[9].mxu0  ;;  %v2499_v3 = vpop.f32.mrb[9].mxu1 }
 0x126   : > { %v3232_v4 = vpop.f32.mrb[10].mxu0  ;;  %v3234_v5 = vpop.f32.mrb[10].mxu1 }
 0x127   : > { %v2444_v7 = vpop.f32.mrb[11].mxu0  ;;  %v2500_v8 = vpop.f32.mrb[11].mxu1 }
 0x12c   : > { %v3238_v9 = vpop.f32.mrb[12].mxu0  ;;  %v3240_v10 = vpop.f32.mrb[12].mxu1 }
 0x12d   : > { %v2447_v12 = vpop.f32.mrb[13].mxu0  ;;  %v2503_v13 = vpop.f32.mrb[13].mxu1 }
 0x12e   : > { %v3244_v14 = vpop.f32.mrb[14].mxu0  ;;  %v3246_v15 = vpop.f32.mrb[14].mxu1 }
 0x12f   : > { %v2448_v17 = vpop.f32.mrb[15].mxu0  ;;  %v2504_v18 = vpop.f32.mrb[15].mxu1 }
 0x134   : > { %v3250_v19 = vpop.f32.mrb[16].mxu0  ;;  %v3252_v20 = vpop.f32.mrb[16].mxu1 }
 0x135   : > { %v2451_v22 = vpop.f32.mrb[17].mxu0  ;;  %v2507_v23 = vpop.f32.mrb[17].mxu1 }
 0x136   : > { %v3256_v24 = vpop.f32.mrb[18].mxu0  ;;  %v3258_v25 = vpop.f32.mrb[18].mxu1 }
 0x137   : > { %v2452_v27 = vpop.f32.mrb[19].mxu0  ;;  %v2508_v28 = vpop.f32.mrb[19].mxu1 }
 0x13c   : > { %v3262_v29 = vpop.f32.mrb[20].mxu0  ;;  %v3264_v30 = vpop.f32.mrb[20].mxu1 }
 0x13d   : > { %v2455_v32 = vpop.f32.mrb[21].mxu0  ;;  %v2511_v33 = vpop.f32.mrb[21].mxu1 }
 0x13e   : > { %v3268_v34 = vpop.f32.mrb[22].mxu0  ;;  %v3270_v35 = vpop.f32.mrb[22].mxu1 }
 0x13f   : > { %v2456_v37 = vpop.f32.mrb[23].mxu0  ;;  %v2512_v38 = vpop.f32.mrb[23].mxu1 }
 0x144   : > { %v3274_v39 = vpop.f32.mrb[24].mxu0  ;;  %v3276_v40 = vpop.f32.mrb[24].mxu1 }
 0x145   : > { %v2459_v42 = vpop.f32.mrb[25].mxu0  ;;  %v2515_v46 = vpop.f32.mrb[25].mxu1 }
 0x146   : > { %v3280_v47 = vpop.f32.mrb[26].mxu0  ;;  %v3282_v51 = vpop.f32.mrb[26].mxu1 }
 0x147   : > { %v2460_v56 = vpop.f32.mrb[27].mxu0  ;;  %v2516_v57 = vpop.f32.mrb[27].mxu1 }
 0x14c   : > { %v3286_v61 = vpop.f32.mrb[28].mxu0  ;;  %v3288_v62 = vpop.f32.mrb[28].mxu1 }
 0x14d   : > { %v2463_v3 = vpop.f32.mrb[29].mxu0  ;;  %v2519_v7 = vpop.f32.mrb[29].mxu1 }
 0x14e   : > { %v3292_v8 = vpop.f32.mrb[30].mxu0  ;;  %v3294_v12 = vpop.f32.mrb[30].mxu1 }
 0x14f   : > { %v2464_v17 = vpop.f32.mrb[31].mxu0  ;;  %v2520_v18 = vpop.f32.mrb[31].mxu1 }
 0x154   : > { %v3298_v22 = vpop.f32.mrb[32].mxu0  ;;  %v3300_v23 = vpop.f32.mrb[32].mxu1 }
 0x155   : > { %v2467_v28 = vpop.f32.mrb[33].mxu0  ;;  %v2523_v32 = vpop.f32.mrb[33].mxu1 }
 0x156   : > { %v3304_v33 = vpop.f32.mrb[34].mxu0  ;;  %v3306_v37 = vpop.f32.mrb[34].mxu1 }
 0x157   : > { %v2468_v42 = vpop.f32.mrb[35].mxu0  ;;  %v2524_v46 = vpop.f32.mrb[35].mxu1 }
 0x15c   : > { %v3310_v56 = vpop.f32.mrb[36].mxu0  ;;  %v3312_v57 = vpop.f32.mrb[36].mxu1 }
 0x15d   : > { %v2471_v7 = vpop.f32.mrb[37].mxu0  ;;  %v2527_v17 = vpop.f32.mrb[37].mxu1 }
 0x15e   : > { %v3316_v18 = vpop.f32.mrb[38].mxu0  ;;  %v3318_v28 = vpop.f32.mrb[38].mxu1 }
 0x15f   : > { %v2472_v27 = vpop.f32.mrb[39].mxu0  ;;  %v2528_v38 = vpop.f32.mrb[39].mxu1 }
 0x164   : > { %v3322_v42 = vpop.f32.mrb[40].mxu0  ;;  %v3324_v46 = vpop.f32.mrb[40].mxu1 }
 0x165   : > { %v2475_v2 = vpop.f32.mrb[41].mxu0  ;;  %v2531_v3 = vpop.f32.mrb[41].mxu1 }
 0x166   : > { %v3328_v7 = vpop.f32.mrb[42].mxu0  ;;  %v3330_v17 = vpop.f32.mrb[42].mxu1 }
 0x167   : > { %v2476_v41 = vpop.f32.mrb[43].mxu0  ;;  %v2532_v32 = vpop.f32.mrb[43].mxu1 }
 0x16c   : > { %v3334_v27 = vpop.f32.mrb[44].mxu0  ;;  %v3336_v38 = vpop.f32.mrb[44].mxu1 }
 0x16d   : > { %v2479_v31 = vpop.f32.mrb[45].mxu0  ;;  %v2535_v13 = vpop.f32.mrb[45].mxu1 }
 0x16e   : > { %v3340_v2 = vpop.f32.mrb[46].mxu0  ;;  %v3342_v3 = vpop.f32.mrb[46].mxu1 }
 0x16f   : > { %v2480_v21 = vpop.f32.mrb[47].mxu0  ;;  %v2536_v52 = vpop.f32.mrb[47].mxu1 }
 0x174   : > { %v3346_v41 = vpop.f32.mrb[48].mxu0  ;;  %v3348_v32 = vpop.f32.mrb[48].mxu1 }
 0x175   : > { %3503 = vst [vmem:[#allocation3_spill] sm:$0xff] %v3348_v32  ;;  %v2483_v11 = vpop.f32.mrb[49].mxu0  ;;  %v2539_v36 = vpop.f32.mrb[49].mxu1 }
 0x176   : > { %v3352_v31 = vpop.f32.mrb[50].mxu0  ;;  %v3354_v13 = vpop.f32.mrb[50].mxu1  ;;  %v3364_v11 = vld [vmem:[%s3499_s2] ss:$0 sm:$0xff] }
 0x177   : > { %3504 = vst [vmem:[#allocation4_spill] sm:$0xff] %v3354_v13  ;;  %v2484_v26 = vpop.f32.mrb[51].mxu0  ;;  %v2540_v21 = vpop.f32.mrb[51].mxu1 }
 0x178   : > { %v3505_v26 = vmax.f32 %v3208_v48, %v3210_v49 }
 0x17c   : > { %v1371_v52 = vpop.f32.mrb[52].mxu0  ;;  %v1665_v1 = vpop.f32.mrb[52].mxu1 }
 0x17d   : > { %v1474_v60 = vmax.f32 %v1180_v45, %v1371_v52  ;;  %v2547_v55 = vpop.f32.mrb[53].mxu0  ;;  %v2603_v16 = vpop.f32.mrb[53].mxu1 }
 0x17e   : > { %v1374_v36 = vpop.f32.mrb[54].mxu0  ;;  %v1668_v50 = vpop.f32.mrb[54].mxu1 }
 0x17f   : > { %v1768_v32 = vmax.f32 %v1474_v60, %v1665_v1  ;;  %v1475_v21 = vmax.f32 %v3505_v26, %v1374_v36  ;;  %v2548_v6 = vpop.f32.mrb[55].mxu0  ;;  %v2604_v13 = vpop.f32.mrb[55].mxu1  ;;  %v3506_v60 = vmax.f32 %v3214_v53, %v3216_v54 }
 0x181   : > { %v1801_v43 = vadd.f32 %v3364_v11, %v1768_v32  ;;  %v1769_v44 = vmax.f32 %v1475_v21, %v1668_v50  ;;  %v3507_v32 = vmax.f32 %v3220_v58, %v3222_v59 }
 0x183   : > { %v1802_v45 = vadd.f32 %v3364_v11, %v1769_v44  ;;  %2735 = vtanh.f32 %v1801_v43 }
 0x184   : > { %v1379_v55 = vpop.f32.mrb[56].mxu0  ;;  %v1673_v16 = vpop.f32.mrb[56].mxu1 }
 0x185   : > { %2737 = vtanh.f32 %v1802_v45  ;;  %v1476_v1 = vmax.f32 %v3506_v60, %v1379_v55  ;;  %v2551_v48 = vpop.f32.mrb[57].mxu0  ;;  %v2607_v49 = vpop.f32.mrb[57].mxu1  ;;  %v3508_v45 = vmax.f32 %v3226_v63, %v3228_v0 }
 0x186   : > { %v1382_v6 = vpop.f32.mrb[58].mxu0  ;;  %v1676_v13 = vpop.f32.mrb[58].mxu1 }
 0x187   : > { %v1770_v52 = vmax.f32 %v1476_v1, %v1673_v16  ;;  %v1477_v50 = vmax.f32 %v3507_v32, %v1382_v6  ;;  %v2552_v36 = vpop.f32.mrb[59].mxu0  ;;  %v2608_v26 = vpop.f32.mrb[59].mxu1  ;;  %v3509_v6 = vmax.f32 %v3232_v4, %v3234_v5 }
 0x189   : > { %v1803_v21 = vadd.f32 %v3364_v11, %v1770_v52  ;;  %v1771_v43 = vmax.f32 %v1477_v50, %v1676_v13 }
 0x18b   : > { %v1804_v44 = vadd.f32 %v3364_v11, %v1771_v43  ;;  %2739 = vtanh.f32 %v1803_v21  ;;  %v3510_v43 = vmax.f32 %v3238_v9, %v3240_v10 }
 0x18c   : > { %v1387_v53 = vpop.f32.mrb[60].mxu0  ;;  %v1681_v54 = vpop.f32.mrb[60].mxu1 }
 0x18d   : > { %2741 = vtanh.f32 %v1804_v44  ;;  %v1478_v55 = vmax.f32 %v3508_v45, %v1387_v53  ;;  %v2555_v16 = vpop.f32.mrb[61].mxu0  ;;  %v2611_v58 = vpop.f32.mrb[61].mxu1 }
 0x18e   : > { %v2736_v59 = vpop.eup %2735  ;;  %v1390_v60 = vpop.f32.mrb[62].mxu0  ;;  %v3511_v58 = vmax.f32 %v3244_v14, %v3246_v15 }
 0x18f   : > { %v1684_v1 = vpop.f32.mrb[62].mxu1  ;;  %v2738_v48 = vpop.eup %2737  ;;  %v1772_v49 = vmax.f32 %v1478_v55, %v1681_v54  ;;  %v1479_v13 = vmax.f32 %v3509_v6, %v1390_v60 }
 0x190   : > { %v2556_v52 = vpop.f32.mrb[63].mxu0  ;;  %v2612_v63 = vpop.f32.mrb[63].mxu1  ;;  %v2295_v0 = vpack.c.bf16 %v2738_v48, %v2736_v59 }
 0x191   : > { %v1805_v32 = vadd.f32 %v3364_v11, %v1772_v49  ;;  %v1773_v50 = vmax.f32 %v1479_v13, %v1684_v1  ;;  %v3512_v52 = vmax.f32 %v3250_v19, %v3252_v20 }
 0x192   : > { %2296 = vst [vmem:[%s3387_s14] sm:$0xff] %v2295_v0  }
 0x193   : > { %v1806_v36 = vadd.f32 %v3364_v11, %v1773_v50  ;;  %2743 = vtanh.f32 %v1805_v32 }
 0x194   : > { %v1395_v26 = vpop.f32.mrb[64].mxu0  ;;  %v1689_v21 = vpop.f32.mrb[64].mxu1 }
 0x195   : > { %2745 = vtanh.f32 %v1806_v36  ;;  %v1480_v44 = vmax.f32 %v3510_v43, %v1395_v26  ;;  %v2559_v4 = vpop.f32.mrb[65].mxu0  ;;  %v2615_v5 = vpop.f32.mrb[65].mxu1 }
 0x196   : > { %v2740_v53 = vpop.eup %2739  ;;  %v1398_v54 = vpop.f32.mrb[66].mxu0 }
 0x197   : > { %v1692_v45 = vpop.f32.mrb[66].mxu1  ;;  %v2742_v55 = vpop.eup %2741  ;;  %v1774_v16 = vmax.f32 %v1480_v44, %v1689_v21  ;;  %v1481_v59 = vmax.f32 %v3511_v58, %v1398_v54  ;;  %v3513_v21 = vmax.f32 %v3256_v24, %v3258_v25 }
 0x198   : > { %v2560_v60 = vpop.f32.mrb[67].mxu0  ;;  %v2616_v1 = vpop.f32.mrb[67].mxu1  ;;  %v2300_v48 = vpack.c.bf16 %v2742_v55, %v2740_v53  ;;  %v3514_v55 = vmax.f32 %v3262_v29, %v3264_v30 }
 0x199   : > { %v1807_v49 = vadd.f32 %v3364_v11, %v1774_v16  ;;  %v1775_v6 = vmax.f32 %v1481_v59, %v1692_v45 }
 0x19a   : > { %2357 = vst [vmem:[%s3387_s14 + $0x8] sm:$0xff] %v2300_v48  }
 0x19b   : > { %v1808_v9 = vadd.f32 %v3364_v11, %v1775_v6  ;;  %2747 = vtanh.f32 %v1807_v49  ;;  %v3515_v49 = vmax.f32 %v3268_v34, %v3270_v35 }
 0x19c   : > { %v1403_v10 = vpop.f32.mrb[68].mxu0  ;;  %v1697_v13 = vpop.f32.mrb[68].mxu1 }
 0x19d   : > { %2749 = vtanh.f32 %v1808_v9  ;;  %v1482_v63 = vmax.f32 %v3512_v52, %v1403_v10  ;;  %v2563_v14 = vpop.f32.mrb[69].mxu0  ;;  %v2619_v15 = vpop.f32.mrb[69].mxu1 }
 0x19e   : > { %v2744_v0 = vpop.eup %2743  ;;  %v1406_v32 = vpop.f32.mrb[70].mxu0  ;;  %v3516_v15 = vmax.f32 %v3274_v39, %v3276_v40 }
 0x19f   : > { %v1700_v50 = vpop.f32.mrb[70].mxu1  ;;  %v2746_v36 = vpop.eup %2745  ;;  %v1776_v26 = vmax.f32 %v1482_v63, %v1697_v13  ;;  %v1483_v43 = vmax.f32 %v3513_v21, %v1406_v32 }
 0x1a0   : > { %v2564_v44 = vpop.f32.mrb[71].mxu0  ;;  %v2620_v4 = vpop.f32.mrb[71].mxu1  ;;  %v2305_v5 = vpack.c.bf16 %v2746_v36, %v2744_v0 }
 0x1a1   : > { %v1809_v53 = vadd.f32 %v3364_v11, %v1776_v26  ;;  %v1777_v54 = vmax.f32 %v1483_v43, %v1700_v50  ;;  %v3517_v43 = vmax.f32 %v3280_v47, %v3282_v51 }
 0x1a2   : > { %2358 = vst [vmem:[%s3387_s14 + $0x10] sm:$0xff] %v2305_v5  }
 0x1a3   : > { %v1810_v19 = vadd.f32 %v3364_v11, %v1777_v54  ;;  %2751 = vtanh.f32 %v1809_v53 }
 0x1a4   : > { %v1411_v20 = vpop.f32.mrb[72].mxu0  ;;  %v1705_v45 = vpop.f32.mrb[72].mxu1 }
 0x1a5   : > { %2753 = vtanh.f32 %v1810_v19  ;;  %v1484_v16 = vmax.f32 %v3514_v55, %v1411_v20  ;;  %v2567_v24 = vpop.f32.mrb[73].mxu0  ;;  %v2623_v25 = vpop.f32.mrb[73].mxu1 }
 0x1a6   : > { %v2748_v58 = vpop.eup %2747  ;;  %v1414_v59 = vpop.f32.mrb[74].mxu0 }
 0x1a7   : > { %v1708_v60 = vpop.f32.mrb[74].mxu1  ;;  %v2750_v1 = vpop.eup %2749  ;;  %v1778_v48 = vmax.f32 %v1484_v16, %v1705_v45  ;;  %v1485_v6 = vmax.f32 %v3515_v49, %v1414_v59  ;;  %v3518_v45 = vmax.f32 %v3286_v61, %v3288_v62 }
 0x1a8   : > { %v2568_v9 = vpop.f32.mrb[75].mxu0  ;;  %v2624_v10 = vpop.f32.mrb[75].mxu1  ;;  %v2310_v13 = vpack.c.bf16 %v2750_v1, %v2748_v58 }
 0x1a9   : > { %v1811_v52 = vadd.f32 %v3364_v11, %v1778_v48  ;;  %v1779_v63 = vmax.f32 %v1485_v6, %v1708_v60  ;;  %v3519_v60 = vmax.f32 %v3292_v8, %v3294_v12 }
 0x1aa   : > { %2359 = vst [vmem:[%s3387_s14 + $0x18] sm:$0xff] %v2310_v13  }
 0x1ab   : > { %v1812_v29 = vadd.f32 %v3364_v11, %v1779_v63  ;;  %2755 = vtanh.f32 %v1811_v52  ;;  %v3520_v52 = vmax.f32 %v3298_v22, %v3300_v23 }
 0x1ac   : > { %v1419_v30 = vpop.f32.mrb[76].mxu0  ;;  %v1713_v14 = vpop.f32.mrb[76].mxu1 }
 0x1ad   : > { %2757 = vtanh.f32 %v1812_v29  ;;  %v1486_v0 = vmax.f32 %v3516_v15, %v1419_v30  ;;  %v2571_v34 = vpop.f32.mrb[77].mxu0  ;;  %v2627_v35 = vpop.f32.mrb[77].mxu1 }
 0x1ae   : > { %v2752_v32 = vpop.eup %2751  ;;  %v1422_v50 = vpop.f32.mrb[78].mxu0  ;;  %v3521_v34 = vmax.f32 %v3304_v33, %v3306_v37 }
 0x1af   : > { %v1716_v36 = vpop.f32.mrb[78].mxu1  ;;  %v2754_v26 = vpop.eup %2753  ;;  %v1780_v21 = vmax.f32 %v1486_v0, %v1713_v14  ;;  %v1487_v44 = vmax.f32 %v3517_v43, %v1422_v50 }
 0x1b0   : > { %v2572_v4 = vpop.f32.mrb[79].mxu0  ;;  %v2628_v5 = vpop.f32.mrb[79].mxu1  ;;  %v2315_v53 = vpack.c.bf16 %v2754_v26, %v2752_v32 }
 0x1b1   : > { %v1813_v54 = vadd.f32 %v3364_v11, %v1780_v21  ;;  %v1781_v19 = vmax.f32 %v1487_v44, %v1716_v36  ;;  %v3522_v44 = vmax.f32 %v3310_v56, %v3312_v57 }
 0x1b2   : > { %2360 = vst [vmem:[%s3387_s14 + $0x20] sm:$0xff] %v2315_v53  }
 0x1b3   : > { %v1814_v39 = vadd.f32 %v3364_v11, %v1781_v19  ;;  %2759 = vtanh.f32 %v1813_v54 }
 0x1b4   : > { %v1427_v40 = vpop.f32.mrb[80].mxu0  ;;  %v1721_v20 = vpop.f32.mrb[80].mxu1 }
 0x1b5   : > { %2761 = vtanh.f32 %v1814_v39  ;;  %v1488_v55 = vmax.f32 %v3518_v45, %v1427_v40  ;;  %v2575_v47 = vpop.f32.mrb[81].mxu0  ;;  %v2631_v51 = vpop.f32.mrb[81].mxu1  ;;  %v3523_v40 = vmax.f32 %v3316_v18, %v3318_v28 }
 0x1b6   : > { %v2756_v16 = vpop.eup %2755  ;;  %v1430_v24 = vpop.f32.mrb[82].mxu0 }
 0x1b7   : > { %v1724_v25 = vpop.f32.mrb[82].mxu1  ;;  %v2758_v58 = vpop.eup %2757  ;;  %v1782_v59 = vmax.f32 %v1488_v55, %v1721_v20  ;;  %v1489_v1 = vmax.f32 %v3519_v60, %v1430_v24 }
 0x1b8   : > { %v2576_v48 = vpop.f32.mrb[83].mxu0  ;;  %v2632_v49 = vpop.f32.mrb[83].mxu1  ;;  %v2320_v6 = vpack.c.bf16 %v2758_v58, %v2756_v16 }
 0x1b9   : > { %v1815_v9 = vadd.f32 %v3364_v11, %v1782_v59  ;;  %v1783_v10 = vmax.f32 %v1489_v1, %v1724_v25  ;;  %v3524_v25 = vmax.f32 %v3322_v42, %v3324_v46 }
 0x1ba   : > { %2361 = vst [vmem:[%s3387_s14 + $0x28] sm:$0xff] %v2320_v6   ;;  %v3525_v6 = vmax.f32 %v3328_v7, %v3330_v17 }
 0x1bb   : > { %v1816_v61 = vadd.f32 %v3364_v11, %v1783_v10  ;;  %2763 = vtanh.f32 %v1815_v9 }
 0x1bc   : > { %v1435_v62 = vpop.f32.mrb[84].mxu0  ;;  %v1729_v13 = vpop.f32.mrb[84].mxu1 }
 0x1bd   : > { %2765 = vtanh.f32 %v1816_v61  ;;  %v1490_v63 = vmax.f32 %v3520_v52, %v1435_v62  ;;  %v2579_v8 = vpop.f32.mrb[85].mxu0  ;;  %v2635_v12 = vpop.f32.mrb[85].mxu1 }
 0x1be   : > { %v2760_v29 = vpop.eup %2759  ;;  %v1438_v30 = vpop.f32.mrb[86].mxu0  ;;  %v3526_v8 = vmax.f32 %v3334_v27, %v3336_v38 }
 0x1bf   : > { %v1732_v14 = vpop.f32.mrb[86].mxu1  ;;  %v2762_v15 = vpop.eup %2761  ;;  %v1784_v0 = vmax.f32 %v1490_v63, %v1729_v13  ;;  %v1491_v35 = vmax.f32 %v3521_v34, %v1438_v30  ;;  %v3527_v34 = vmax.f32 %v3340_v2, %v3342_v3 }
 0x1c0   : > { %v2580_v32 = vpop.f32.mrb[87].mxu0  ;;  %v2636_v50 = vpop.f32.mrb[87].mxu1  ;;  %v2325_v36 = vpack.c.bf16 %v2762_v15, %v2760_v29 }
 0x1c1   : > { %v1817_v26 = vadd.f32 %v3364_v11, %v1784_v0  ;;  %v1785_v21 = vmax.f32 %v1491_v35, %v1732_v14 }
 0x1c2   : > { %2362 = vst [vmem:[%s3387_s14 + $0x30] sm:$0xff] %v2325_v36  }
 0x1c3   : > { %v1818_v22 = vadd.f32 %v3364_v11, %v1785_v21  ;;  %2767 = vtanh.f32 %v1817_v26 }
 0x1c4   : > { %v1443_v23 = vpop.f32.mrb[88].mxu0  ;;  %v1737_v43 = vpop.f32.mrb[88].mxu1 }
 0x1c5   : > { %2769 = vtanh.f32 %v1818_v22  ;;  %v1492_v4 = vmax.f32 %v3522_v44, %v1443_v23  ;;  %v2583_v33 = vpop.f32.mrb[89].mxu0  ;;  %v2639_v37 = vpop.f32.mrb[89].mxu1  ;;  %v3528_v23 = vld [vmem:[#allocation3_spill] sm:$0xff] }
 0x1c6   : > { %v2764_v5 = vpop.eup %2763  ;;  %v1446_v53 = vpop.f32.mrb[90].mxu0 }
 0x1c7   : > { %v1740_v54 = vpop.f32.mrb[90].mxu1  ;;  %v2766_v19 = vpop.eup %2765  ;;  %v1786_v39 = vmax.f32 %v1492_v4, %v1737_v43  ;;  %v1493_v20 = vmax.f32 %v3523_v40, %v1446_v53  ;;  %v3529_v43 = vmax.f32 %v3346_v41, %v3528_v23 }
 0x1c8   : > { %v2584_v45 = vpop.f32.mrb[91].mxu0  ;;  %v2640_v55 = vpop.f32.mrb[91].mxu1  ;;  %v2330_v47 = vpack.c.bf16 %v2766_v19, %v2764_v5 }
 0x1c9   : > { %v1819_v51 = vadd.f32 %v3364_v11, %v1786_v39  ;;  %v1787_v16 = vmax.f32 %v1493_v20, %v1740_v54  ;;  %v3530_v54 = vld [vmem:[#allocation4_spill] sm:$0xff] }
 0x1ca   : > { %2363 = vst [vmem:[%s3387_s14 + $0x38] sm:$0xff] %v2330_v47   ;;  %v3531_v19 = vmax.f32 %v3352_v31, %v3530_v54 }
 0x1cb   : > { %v1820_v56 = vadd.f32 %v3364_v11, %v1787_v16  ;;  %2771 = vtanh.f32 %v1819_v51 }
 0x1cc   : > { %v1451_v57 = vpop.f32.mrb[92].mxu0  ;;  %v1745_v24 = vpop.f32.mrb[92].mxu1 }
 0x1cd   : > { %2773 = vtanh.f32 %v1820_v56  ;;  %v1494_v58 = vmax.f32 %v3524_v25, %v1451_v57  ;;  %v2587_v18 = vpop.f32.mrb[93].mxu0  ;;  %v2643_v28 = vpop.f32.mrb[93].mxu1 }
 0x1ce   : > { %v2768_v59 = vpop.eup %2767  ;;  %v1454_v60 = vpop.f32.mrb[94].mxu0 }
 0x1cf   : > { %v1748_v1 = vpop.f32.mrb[94].mxu1  ;;  %v2770_v48 = vpop.eup %2769  ;;  %v1788_v49 = vmax.f32 %v1494_v58, %v1745_v24  ;;  %v1495_v9 = vmax.f32 %v3525_v6, %v1454_v60 }
 0x1d0   : > { %v2588_v10 = vpop.f32.mrb[95].mxu0  ;;  %v2644_v61 = vpop.f32.mrb[95].mxu1  ;;  %v2335_v62 = vpack.c.bf16 %v2770_v48, %v2768_v59 }
 0x1d1   : > { %v1821_v13 = vadd.f32 %v3364_v11, %v1788_v49  ;;  %v1789_v52 = vmax.f32 %v1495_v9, %v1748_v1 }
 0x1d2   : > { %2364 = vst [vmem:[%s3387_s14 + $0x40] sm:$0xff] %v2335_v62  }
 0x1d3   : > { %v1822_v42 = vadd.f32 %v3364_v11, %v1789_v52  ;;  %2775 = vtanh.f32 %v1821_v13 }
 0x1d4   : > { %v1459_v46 = vpop.f32.mrb[96].mxu0  ;;  %v1753_v63 = vpop.f32.mrb[96].mxu1 }
 0x1d5   : > { %2777 = vtanh.f32 %v1822_v42  ;;  %v1496_v12 = vmax.f32 %v3526_v8, %v1459_v46  ;;  %v2591_v7 = vpop.f32.mrb[97].mxu0  ;;  %v2647_v17 = vpop.f32.mrb[97].mxu1 }
 0x1d6   : > { %v2772_v29 = vpop.eup %2771  ;;  %v1462_v30 = vpop.f32.mrb[98].mxu0 }
 0x1d7   : > { %v1756_v14 = vpop.f32.mrb[98].mxu1  ;;  %v2774_v15 = vpop.eup %2773  ;;  %v1790_v0 = vmax.f32 %v1496_v12, %v1753_v63  ;;  %v1497_v35 = vmax.f32 %v3527_v34, %v1462_v30 }
 0x1d8   : > { %v2592_v32 = vpop.f32.mrb[99].mxu0  ;;  %v2648_v50 = vpop.f32.mrb[99].mxu1  ;;  %v2340_v36 = vpack.c.bf16 %v2774_v15, %v2772_v29 }
 0x1d9   : > { %v1823_v26 = vadd.f32 %v3364_v11, %v1790_v0  ;;  %v1791_v21 = vmax.f32 %v1497_v35, %v1756_v14 }
 0x1da   : > { %2365 = vst [vmem:[%s3387_s14 + $0x48] sm:$0xff] %v2340_v36  }
 0x1db   : > { %v1824_v27 = vadd.f32 %v3364_v11, %v1791_v21  ;;  %2779 = vtanh.f32 %v1823_v26 }
 0x1dc   : > { %v1467_v38 = vpop.f32.mrb[100].mxu0  ;;  %v1761_v22 = vpop.f32.mrb[100].mxu1 }
 0x1dd   : > { %2781 = vtanh.f32 %v1824_v27  ;;  %v1498_v44 = vmax.f32 %v3529_v43, %v1467_v38  ;;  %v2595_v2 = vpop.f32.mrb[101].mxu0  ;;  %v2651_v3 = vpop.f32.mrb[101].mxu1 }
 0x1de   : > { %v2776_v4 = vpop.eup %2775  ;;  %v1470_v33 = vpop.f32.mrb[102].mxu0 }
 0x1df   : > { %v1764_v37 = vpop.f32.mrb[102].mxu1  ;;  %v2778_v5 = vpop.eup %2777  ;;  %v1792_v53 = vmax.f32 %v1498_v44, %v1761_v22  ;;  %v1499_v39 = vmax.f32 %v3531_v19, %v1470_v33 }
 0x1e0   : > { %v2596_v40 = vpop.f32.mrb[103].mxu0  ;;  %v2652_v20 = vpop.f32.mrb[103].mxu1  ;;  %v2345_v45 = vpack.c.bf16 %v2778_v5, %v2776_v4 }
 0x1e1   : > { %v1825_v55 = vadd.f32 %v3364_v11, %v1792_v53  ;;  %v1793_v41 = vmax.f32 %v1499_v39, %v1764_v37 }
 0x1e2   : > { %2366 = vst [vmem:[%s3387_s14 + $0x50] sm:$0xff] %v2345_v45  }
 0x1e3   : > { %v1826_v47 = vadd.f32 %v3364_v11, %v1793_v41  ;;  %2783 = vtanh.f32 %v1825_v55 }
 0x1e5   : > { %2785 = vtanh.f32 %v1826_v47  ;;  %v2780_v51 = vpop.eup %2779 }
 0x1e7   : > { %v2782_v16 = vpop.eup %2781 }
 0x1e8   : > { %v2350_v56 = vpack.c.bf16 %v2782_v16, %v2780_v51 }
 0x1ea   : > { %2367 = vst [vmem:[%s3387_s14 + $0x58] sm:$0xff] %v2350_v56  }
 0x1ed   : > { %v2784_v57 = vpop.eup %2783 }
 0x1ef   : > { %v2786_v24 = vpop.eup %2785 }
 0x1f0   : > { %v2355_v31 = vpack.c.bf16 %v2786_v24, %v2784_v57 }
 0x1f2   : > { %2368 = vst [vmem:[%s3387_s14 + $0x60] sm:$0xff] %v2355_v31  }
 0x1f3 PF: > { %p10_p9 = scmp.ge.s32.totalorder %s2850_s16, 4   ;;  %s3532_s12 = smov %s2805_s13 }
 0x1f4   : > { %s3533_s13 = smov %s2859_s19  ;;  %s3534_s14 = smov %s2850_s16 }
 0x1f5   :  { %12 = sbr.rel (!%p10_p9) target bundleno = 2 (0x2), region = 111 }

// kernel: lenet5_forward.4
= control target key start
LH: loop header
LB: loop body
LE: loop exit
PB: predicated region body
PF: predicated region fallthrough
CT: control target
= control target key end

     0   :  { %s965_s12 = smov 0   ;;  %s967_s13 = smov 0   ;;  %s1170_s0 = inlined_call_operand.vmem [shape: bf16[4,64,160], index: 0, kind: input, shape index: {}]   ;;  %s1171_s1 = inlined_call_operand.vmem [shape: bf16[160,128], index: 1, kind: input, shape index: {}]   ;;  %s1172_s2 = inlined_call_operand.vmem [shape: f32[1,128], index: 2, kind: input, shape index: {}]   ;;  %s1173_s3 = inlined_call_operand.vmem [shape: bf16[64,128], index: 3, kind: output, shape index: {}]  }
   0x1   :  { %s969_s14 = smov 0  }
   0x2 LB: > { %s771_s15 = sadd.s32 4294967295, %s942_s14   ;;  %s982_s16 = sadd.s32 1, %s942_s14   ;;  %s942_s14 = sphi %s969_s14, %s1176_s14   ;;  %s938_s13 = sphi %s967_s13, %s1175_s13   ;;  %s934_s12 = sphi %s965_s12, %s1174_s12  }
   0x3   : > { %s17_s17 = ssub.s32 %s942_s14, %s982_s16  ;;  %s20_s18 = sadd.s32 1, %s938_s13 }
   0x4   : > { %p18_p0 = scmp.eq.s32.totalorder %s17_s17, 0  ;;  %p27_p1 = scmp.ne.s32.totalorder %s938_s13, %s934_s12 }
   0x5   : > { %p28_p2 = scmp.eq.s32.totalorder %s942_s14, 0  ;;  %p774_p4 = scmp.ge.s32.totalorder %s942_s14, 2 }
   0x6   : > { %s991_s19 = scalar_select %p18_p0, %s938_s13, %s20_s18  }
   0x7   : > { %p29_p3 = por %p28_p2, %p27_p1  ;;  %127 = sbr.rel (%p774_p4) target bundleno = 26 (0x1a), region = 24 }
   0xe   : > { %130 = sbr.rel (!%p29_p3) target bundleno = 26 (0x1a), region = 28  ;;  %s132_s20 = sand.u32 (%p29_p3), 1, %s938_s13  }
   0xf   : > { %s837_s21 = sshll.u32 (%p29_p3), %s942_s14, 5  ;;  %s775_s22 = sshll.u32 (%p29_p3), %s132_s20, 7 }
  0x10   : > { %s999_s25 = scalar_lea.vmem (%p29_p3), %s1170_s0, %s837_s21  ;;  %s134_s26 = scalar_lea.vmem (%p29_p3), [#allocation2], %s775_s22 }
  0x11   : > { %v196_v0 = vld [vmem:[%s999_s25] sm:$0xff] (%p29_p3)  ;;  %v198_v1 = vld [vmem:[%s999_s25 + $0x8] sm:$0xff] (%p29_p3)  ;;  %v200_v2 = vld [vmem:[%s999_s25 + $0x10] sm:$0xff] (%p29_p3) }
  0x12   : > { %197 = vst [vmem:[%s134_s26] sm:$0xff] (%p29_p3), %v196_v0  ;;  %199 = vst [vmem:[%s134_s26 + $0x8] sm:$0xff] (%p29_p3), %v198_v1  ;;  %v202_v3 = vld [vmem:[%s999_s25 + $0x18] sm:$0xff] (%p29_p3)  ;;  %v204_v4 = vld [vmem:[%s999_s25 + $0x40] sm:$0xff] (%p29_p3) }
  0x13   : > { %201 = vst [vmem:[%s134_s26 + $0x10] sm:$0xff] (%p29_p3), %v200_v2  ;;  %v206_v5 = vld [vmem:[%s999_s25 + $0x48] sm:$0xff] (%p29_p3)  ;;  %203 = vst [vmem:[%s134_s26 + $0x18] sm:$0xff] (%p29_p3), %v202_v3  ;;  %v208_v6 = vld [vmem:[%s999_s25 + $0x50] sm:$0xff] (%p29_p3) }
  0x14   : > { %205 = vst [vmem:[%s134_s26 + $0x20] sm:$0xff] (%p29_p3), %v204_v4  ;;  %207 = vst [vmem:[%s134_s26 + $0x28] sm:$0xff] (%p29_p3), %v206_v5  ;;  %v210_v7 = vld [vmem:[%s999_s25 + $0x58] sm:$0xff] (%p29_p3)  ;;  %v212_v8 = vld [vmem:[%s999_s25 + $0x80] sm:$0xff] (%p29_p3) }
  0x15   : > { %209 = vst [vmem:[%s134_s26 + $0x30] sm:$0xff] %v208_v6  ;;  %211 = vst [vmem:[%s134_s26 + $0x38] sm:$0xff] %v210_v7  ;;  %v214_v9 = vld [vmem:[%s999_s25 + $0x88] sm:$0xff]  ;;  %v216_v10 = vld [vmem:[%s999_s25 + $0x90] sm:$0xff] }
  0x16   : > { %213 = vst [vmem:[%s134_s26 + $0x40] sm:$0xff] %v212_v8  ;;  %v218_v11 = vld [vmem:[%s999_s25 + $0x98] sm:$0xff]  ;;  %215 = vst [vmem:[%s134_s26 + $0x48] sm:$0xff] %v214_v9  ;;  %v220_v12 = vld [vmem:[%s999_s25 + $0xc0] sm:$0xff] }
  0x17   : > { %217 = vst [vmem:[%s134_s26 + $0x50] sm:$0xff] %v216_v10  ;;  %219 = vst [vmem:[%s134_s26 + $0x58] sm:$0xff] %v218_v11  ;;  %v222_v13 = vld [vmem:[%s999_s25 + $0xc8] sm:$0xff]  ;;  %v224_v14 = vld [vmem:[%s999_s25 + $0xd0] sm:$0xff] }
  0x18   : > { %221 = vst [vmem:[%s134_s26 + $0x60] sm:$0xff] %v220_v12  ;;  %223 = vst [vmem:[%s134_s26 + $0x68] sm:$0xff] %v222_v13  ;;  %v226_v15 = vld [vmem:[%s999_s25 + $0xd8] sm:$0xff] }
  0x19   : > { %225 = vst [vmem:[%s134_s26 + $0x70] sm:$0xff] %v224_v14  ;;  %227 = vst [vmem:[%s134_s26 + $0x78] sm:$0xff] %v226_v15 }
  0x1a PF: > { %p779_p5 = scmp.ge.s32.totalorder %s942_s14, 1  ;;  %p232_p6 = scmp.lt.s32.totalorder %s942_s14, 3 }
  0x1c   : > { %p233_p7 = pnand %p779_p5, %p232_p6 }
  0x1d   : > { %v1022_v16 = vld [vmem:[%s1171_s1] sm:$0xff] (!%p233_p7)   ;;  %v944_v17 = vmov (!%p233_p7), 0   ;;  %v1031_v18 = vld [vmem:[%s1171_s1 + $0x8] sm:$0xff] (!%p233_p7)   ;;  %s239_s4 = sand.u32 (!%p233_p7), 1, %s934_s12   ;;  %v1041_v19 = vld [vmem:[%s1171_s1 + $0x10] sm:$0xff] (!%p233_p7)   ;;  %vm372_vm0 = vcmask (!%p233_p7), 261120  }
  0x1e   : > { %236 = sbr.rel (%p233_p7) target bundleno = 352 (0x160), region = 66  ;;  %379 = vmatprep.subr.bf16.mxu0 (!%p233_p7), %v944_v17  ;;  %457 = vmatprep.subr.bf16.mxu1 (!%p233_p7), %v944_v17  ;;  %s780_s5 = sshll.u32 (!%p233_p7), %s239_s4, 7  ;;  %v1050_v20 = vld [vmem:[%s1171_s1 + $0x18] sm:$0xff] (!%p233_p7)   ;;  %v1064_v23 = vld [vmem:[%s1171_s1 + $0x20] sm:$0xff] (!%p233_p7)   ;;  %v1074_v24 = vld [vmem:[%s1171_s1 + $0x28] sm:$0xff] (!%p233_p7)  }
  0x1f   : > { %380 = vmatpush1.bf16.msra.mxu0 (!%p233_p7), %v1022_v16  ;;  %458 = vmatpush1.bf16.msra.mxu1 (!%p233_p7), %v1022_v16  ;;  %s1052_s10 = scalar_lea.vmem (!%p233_p7), [#allocation2], %s780_s5  ;;  %v884_v25 = vld [vmem:[%s1171_s1 + $0x30] sm:$0xff] (!%p233_p7)   ;;  %v885_v26 = vld [vmem:[%s1171_s1 + $0x38] sm:$0xff] (!%p233_p7)   ;;  %v886_v27 = vld [vmem:[%s1171_s1 + $0x40] sm:$0xff] (!%p233_p7)   ;;  %s781_s30 = sshll.u32 (!%p233_p7), %s771_s15, 2 }
  0x20   : > { %381 = vmatprep.subr.bf16.mxu0 (!%p233_p7), %v944_v17  ;;  %459 = vmatprep.subr.bf16.mxu1 (!%p233_p7), %v944_v17  ;;  %v890_v21 = vld [vmem:[%s1052_s10 + $0x4] ss:$8 sps:$4 sm:$0xff] (!%p233_p7)   ;;  %v888_v29 = vld [vmem:[%s1052_s10] ss:$8 sps:$4 sm:$0xff] (!%p233_p7)   ;;  %v894_v31 = vld [vmem:[%s1052_s10 + $0x14] ss:$8 sps:$4 sm:$0xff] (!%p233_p7)  }
  0x21   : > { %v893_v22 = vld [vmem:[%s1052_s10 + $0x24] ss:$8 sps:$4 sm:$0xff] (!%p233_p7)   ;;  %797 = vmatprep.mubr.msk.bf16.mxu0 (!%p233_p7), %vm372_vm0, %v890_v21  ;;  %v891_v30 = vld [vmem:[%s1052_s10 + $0x20] ss:$8 sps:$4 sm:$0xff] (!%p233_p7)   ;;  %v897_v32 = vld [vmem:[%s1052_s10 + $0x34] ss:$8 sps:$4 sm:$0xff] (!%p233_p7)  }
  0x22   : > { %807 = vmatprep.mubr.msk.bf16.mxu1 (!%p233_p7), %vm372_vm0, %v893_v22  ;;  %v887_v28 = vld [vmem:[%s1171_s1 + $0x48] sm:$0xff] (!%p233_p7)   ;;  %v896_v33 = vld [vmem:[%s1052_s10 + $0x10] ss:$8 sps:$4 sm:$0xff] (!%p233_p7)   ;;  %v906_v39 = vld [vmem:[%s1052_s10 + $0x54] ss:$8 sps:$4 sm:$0xff] (!%p233_p7)   ;;  %p264_p8 = scmp.lt.s32.totalorder (!%p233_p7), %s781_s30, 7 }
  0x23   : > { %382 = vmatpush1.bf16.msra.mxu0 (!%p233_p7), %v1031_v18  ;;  %460 = vmatpush1.bf16.msra.mxu1 (!%p233_p7), %v1031_v18  ;;  %v899_v34 = vld [vmem:[%s1052_s10 + $0x30] ss:$8 sps:$4 sm:$0xff] (!%p233_p7)   ;;  %v902_v35 = vld [vmem:[%s1052_s10 + $0x44] ss:$8 sps:$4 sm:$0xff] (!%p233_p7)   ;;  %v900_v37 = vld [vmem:[%s1052_s10 + $0x40] ss:$8 sps:$4 sm:$0xff] (!%p233_p7)  }
  0x24   : > { %383 = vmatprep.subr.bf16.mxu0 (!%p233_p7), %v944_v17  ;;  %461 = vmatprep.subr.bf16.mxu1 (!%p233_p7), %v944_v17  ;;  %v905_v36 = vld [vmem:[%s1052_s10 + $0x64] ss:$8 sps:$4 sm:$0xff] (!%p233_p7)   ;;  %v903_v38 = vld [vmem:[%s1052_s10 + $0x60] ss:$8 sps:$4 sm:$0xff] (!%p233_p7)   ;;  %v908_v40 = vld [vmem:[%s1052_s10 + $0x74] ss:$8 sps:$4 sm:$0xff] (!%p233_p7)  }
  0x25   : > { %v910_v41 = vld [vmem:[%s1052_s10 + $0x50] ss:$8 sps:$4 sm:$0xff]   ;;  %v829_v4 = vld [vmem:[%s1172_s2] ss:$0 sm:$0xff]  ;;  %s1178_s30 = smov (!%p264_p8, %s781_s30), 7 }
  0x26   : > { %v911_v42 = vld [vmem:[%s1052_s10 + $0x70] ss:$8 sps:$4 sm:$0xff]   ;;  %s782_s14 = sshll.u32 %s1178_s30, 2 }
  0x27   : > { %384 = vmatpush1.bf16.msra.mxu0 %v1041_v19  ;;  %462 = vmatpush1.bf16.msra.mxu1 %v1041_v19  ;;  %s267_s5 = scalar_lea.vmem %s1173_s3, %s782_s14 }
  0x28   : > { %385 = vmatprep.subr.bf16.mxu0 %v944_v17  ;;  %463 = vmatprep.subr.bf16.mxu1 %v944_v17 }
  0x2b   : > { %386 = vmatpush1.bf16.msra.mxu0 %v1050_v20  ;;  %464 = vmatpush1.bf16.msra.mxu1 %v1050_v20 }
  0x2c   : > { %387 = vmatprep.subr.bf16.mxu0 %v944_v17  ;;  %465 = vmatprep.subr.bf16.mxu1 %v944_v17 }
  0x2f   : > { %388 = vmatpush1.bf16.msra.mxu0 %v1064_v23  ;;  %466 = vmatpush1.bf16.msra.mxu1 %v1064_v23 }
  0x30   : > { %389 = vmatprep.subr.bf16.mxu0 %v944_v17  ;;  %467 = vmatprep.subr.bf16.mxu1 %v944_v17 }
  0x33   : > { %390 = vmatpush1.bf16.msra.mxu0 %v1074_v24  ;;  %468 = vmatpush1.bf16.msra.mxu1 %v1074_v24 }
  0x34   : > { %391 = vmatprep.subr.bf16.mxu0 %v944_v17  ;;  %469 = vmatprep.subr.bf16.mxu1 %v944_v17 }
  0x37   : > { %392 = vmatpush1.bf16.msra.mxu0 %v884_v25  ;;  %470 = vmatpush1.bf16.msra.mxu1 %v884_v25 }
  0x38   : > { %393 = vmatprep.subr.bf16.mxu0 %v944_v17  ;;  %471 = vmatprep.subr.bf16.mxu1 %v944_v17 }
  0x3b   : > { %394 = vmatpush1.bf16.msra.mxu0 %v885_v26  ;;  %472 = vmatpush1.bf16.msra.mxu1 %v885_v26 }
  0x3c   : > { %395 = vmatprep.subr.bf16.mxu0 %v944_v17  ;;  %473 = vmatprep.subr.bf16.mxu1 %v944_v17 }
  0x3f   : > { %396 = vmatpush1.bf16.msra.mxu0 %v886_v27  ;;  %474 = vmatpush1.bf16.msra.mxu1 %v886_v27 }
  0x40   : > { %397 = vmatprep.subr.bf16.mxu0 %v944_v17  ;;  %475 = vmatprep.subr.bf16.mxu1 %v944_v17 }
  0x43   : > { %398 = vmatpush1.bf16.msra.mxu0 %v887_v28  ;;  %476 = vmatpush1.bf16.msra.mxu1 %v887_v28 }
  0x44   : > { %539 = vmatprep.subr.bf16.mxu0 %v944_v17  ;;  %621 = vmatprep.subr.bf16.mxu1 %v944_v17 }
  0x46   : > { %412 = vmatmul.mubr.bf16.vlgmr.msra.gmra.mrb[0].mxu0 %v888_v29  ;;  %490 = vmatmul.mubr.bf16.vlgmr.msra.gmra.mrb[0].mxu1 %v891_v30 }
  0x47   : > { %540 = vmatpush1.bf16.msra.mxu0 %v1022_v16  ;;  %622 = vmatpush1.bf16.msra.mxu1 %v1022_v16 }
  0x48   : > { %541 = vmatprep.subr.bf16.mxu0 %v944_v17  ;;  %623 = vmatprep.subr.bf16.mxu1 %v944_v17 }
  0x49   : > { %798 = vmatprep.mubr.msk.bf16.mxu0 %vm372_vm0, %v894_v31  ;;  %808 = vmatprep.mubr.msk.bf16.mxu1 %vm372_vm0, %v897_v32 }
  0x4b   : > { %542 = vmatpush1.bf16.msra.mxu0 %v1031_v18  ;;  %624 = vmatpush1.bf16.msra.mxu1 %v1031_v18 }
  0x4c   : > { %543 = vmatprep.subr.bf16.mxu0 %v944_v17  ;;  %625 = vmatprep.subr.bf16.mxu1 %v944_v17 }
  0x4e   : > { %420 = vmatmul.mubr.bf16.gmra.mrb[4].mxu0 %v896_v33  ;;  %498 = vmatmul.mubr.bf16.gmra.mrb[4].mxu1 %v899_v34 }
  0x4f   : > { %544 = vmatpush1.bf16.msra.mxu0 %v1041_v19  ;;  %626 = vmatpush1.bf16.msra.mxu1 %v1041_v19 }
  0x50   : > { %545 = vmatprep.subr.bf16.mxu0 %v944_v17  ;;  %627 = vmatprep.subr.bf16.mxu1 %v944_v17 }
  0x51   : > { %817 = vmatprep.mubr.msk.bf16.mxu0 %vm372_vm0, %v902_v35  ;;  %827 = vmatprep.mubr.msk.bf16.mxu1 %vm372_vm0, %v905_v36 }
  0x53   : > { %546 = vmatpush1.bf16.msra.mxu0 %v1050_v20  ;;  %628 = vmatpush1.bf16.msra.mxu1 %v1050_v20 }
  0x54   : > { %547 = vmatprep.subr.bf16.mxu0 %v944_v17  ;;  %629 = vmatprep.subr.bf16.mxu1 %v944_v17 }
  0x57   : > { %548 = vmatpush1.bf16.msra.mxu0 %v1064_v23  ;;  %630 = vmatpush1.bf16.msra.mxu1 %v1064_v23 }
  0x58   : > { %549 = vmatprep.subr.bf16.mxu0 %v944_v17  ;;  %631 = vmatprep.subr.bf16.mxu1 %v944_v17 }
  0x5b   : > { %550 = vmatpush1.bf16.msra.mxu0 %v1074_v24  ;;  %632 = vmatpush1.bf16.msra.mxu1 %v1074_v24 }
  0x5c   : > { %551 = vmatprep.subr.bf16.mxu0 %v944_v17  ;;  %633 = vmatprep.subr.bf16.mxu1 %v944_v17 }
  0x5f   : > { %552 = vmatpush1.bf16.msra.mxu0 %v884_v25  ;;  %634 = vmatpush1.bf16.msra.mxu1 %v884_v25 }
  0x60   : > { %553 = vmatprep.subr.bf16.mxu0 %v944_v17  ;;  %635 = vmatprep.subr.bf16.mxu1 %v944_v17 }
  0x63   : > { %554 = vmatpush1.bf16.msra.mxu0 %v885_v26  ;;  %636 = vmatpush1.bf16.msra.mxu1 %v885_v26 }
  0x64   : > { %555 = vmatprep.subr.bf16.mxu0 %v944_v17  ;;  %637 = vmatprep.subr.bf16.mxu1 %v944_v17 }
  0x67   : > { %556 = vmatpush1.bf16.msra.mxu0 %v886_v27  ;;  %638 = vmatpush1.bf16.msra.mxu1 %v886_v27 }
  0x68   : > { %557 = vmatprep.subr.bf16.mxu0 %v944_v17  ;;  %639 = vmatprep.subr.bf16.mxu1 %v944_v17 }
  0x6b   : > { %558 = vmatpush1.bf16.msra.mxu0 %v887_v28  ;;  %640 = vmatpush1.bf16.msra.mxu1 %v887_v28 }
  0x6e   : > { %572 = vmatmul.mubr.bf16.vlgmr.msra.gmra.mrb[8].mxu0 %v900_v37  ;;  %654 = vmatmul.mubr.bf16.vlgmr.msra.gmra.mrb[8].mxu1 %v903_v38 }
  0x6f   : > { %818 = vmatprep.mubr.msk.bf16.mxu0 %vm372_vm0, %v906_v39  ;;  %828 = vmatprep.mubr.msk.bf16.mxu1 %vm372_vm0, %v908_v40 }
  0x76   : > { %580 = vmatmul.mubr.bf16.gmra.mrb[12].mxu0 %v910_v41  ;;  %662 = vmatmul.mubr.bf16.gmra.mrb[12].mxu1 %v911_v42 }
 0x119   : > { %v413_v43 = vpop.f32.mrb[0].mxu0  ;;  %v491_v44 = vpop.f32.mrb[0].mxu1 }
 0x11a   : > { %v506_v45 = vmax.f32 %v413_v43, %v491_v44  ;;  %v415_v46 = vpop.f32.mrb[1].mxu0  ;;  %v493_v47 = vpop.f32.mrb[1].mxu1 }
 0x11b   : > { %v416_v48 = vpop.f32.mrb[2].mxu0  ;;  %v494_v49 = vpop.f32.mrb[2].mxu1 }
 0x11c   : > { %v507_v50 = vmax.f32 %v416_v48, %v494_v49  ;;  %v418_v51 = vpop.f32.mrb[3].mxu0  ;;  %v496_v52 = vpop.f32.mrb[3].mxu1 }
 0x121   : > { %v421_v53 = vpop.f32.mrb[4].mxu0  ;;  %v499_v54 = vpop.f32.mrb[4].mxu1 }
 0x122   : > { %v423_v55 = vpop.f32.mrb[5].mxu0  ;;  %v508_v56 = vmax.f32 %v421_v53, %v499_v54  ;;  %v501_v57 = vpop.f32.mrb[5].mxu1 }
 0x123   : > { %v424_v58 = vpop.f32.mrb[6].mxu0  ;;  %v502_v59 = vpop.f32.mrb[6].mxu1 }
 0x124   : > { %v426_v60 = vpop.f32.mrb[7].mxu0  ;;  %v509_v61 = vmax.f32 %v424_v58, %v502_v59  ;;  %v504_v62 = vpop.f32.mrb[7].mxu1 }
 0x141   : > { %v573_v63 = vpop.f32.mrb[8].mxu0  ;;  %v655_v0 = vpop.f32.mrb[8].mxu1 }
 0x142   : > { %v588_v1 = vmax.f32 %v506_v45, %v573_v63  ;;  %v575_v2 = vpop.f32.mrb[9].mxu0  ;;  %v657_v3 = vpop.f32.mrb[9].mxu1 }
 0x143   : > { %v576_v5 = vpop.f32.mrb[10].mxu0  ;;  %v658_v6 = vpop.f32.mrb[10].mxu1 }
 0x144   : > { %v670_v7 = vmax.f32 %v588_v1, %v655_v0  ;;  %v589_v8 = vmax.f32 %v507_v50, %v576_v5  ;;  %v578_v9 = vpop.f32.mrb[11].mxu0  ;;  %v660_v10 = vpop.f32.mrb[11].mxu1 }
 0x146   : > { %v681_v11 = vadd.f32 %v829_v4, %v670_v7  ;;  %v671_v12 = vmax.f32 %v589_v8, %v658_v6 }
 0x148   : > { %v682_v13 = vadd.f32 %v829_v4, %v671_v12  ;;  %912 = vtanh.f32 %v681_v11 }
 0x149   : > { %v581_v14 = vpop.f32.mrb[12].mxu0  ;;  %v663_v15 = vpop.f32.mrb[12].mxu1 }
 0x14a   : > { %914 = vtanh.f32 %v682_v13  ;;  %v590_v16 = vmax.f32 %v508_v56, %v581_v14  ;;  %v583_v17 = vpop.f32.mrb[13].mxu0  ;;  %v665_v18 = vpop.f32.mrb[13].mxu1 }
 0x14b   : > { %v584_v19 = vpop.f32.mrb[14].mxu0  ;;  %v666_v20 = vpop.f32.mrb[14].mxu1 }
 0x14c   : > { %v672_v21 = vmax.f32 %v590_v16, %v663_v15  ;;  %v591_v22 = vmax.f32 %v509_v61, %v584_v19  ;;  %v586_v23 = vpop.f32.mrb[15].mxu0  ;;  %v668_v24 = vpop.f32.mrb[15].mxu1 }
 0x14e   : > { %v683_v25 = vadd.f32 %v829_v4, %v672_v21  ;;  %v673_v26 = vmax.f32 %v591_v22, %v666_v20 }
 0x150   : > { %v684_v27 = vadd.f32 %v829_v4, %v673_v26  ;;  %916 = vtanh.f32 %v683_v25 }
 0x152   : > { %918 = vtanh.f32 %v684_v27  ;;  %v913_v28 = vpop.eup %912 }
 0x154   : > { %v915_v29 = vpop.eup %914 }
 0x155   : > { %v845_v30 = vpack.c.bf16 %v915_v29, %v913_v28 }
 0x157   : > { %846 = vst [vmem:[%s267_s5] sm:$0xff] %v845_v30  }
 0x15a   : > { %v917_v31 = vpop.eup %916 }
 0x15c   : > { %v919_v32 = vpop.eup %918 }
 0x15d   : > { %v850_v33 = vpack.c.bf16 %v919_v32, %v917_v31 }
 0x15f   : > { %852 = vst [vmem:[%s267_s5 + $0x8] sm:$0xff] %v850_v33  }
 0x160 PF: > { %p10_p9 = scmp.ge.s32.totalorder %s982_s16, 4   ;;  %s1174_s12 = smov %s938_s13 }
 0x161   : > { %s1175_s13 = smov %s991_s19  ;;  %s1176_s14 = smov %s982_s16 }
 0x162   :  { %12 = sbr.rel (!%p10_p9) target bundleno = 2 (0x2), region = 108 }

// kernel: lenet5_forward.5
= control target key start
LH: loop header
LB: loop body
LE: loop exit
PB: predicated region body
PF: predicated region fallthrough
CT: control target
= control target key end

     0   :  { %v766_v0 = vmov 0   ;;  %vm257_vm0 = vcmask 130048   ;;  %v767_v30 = vmov 0.0   ;;  %vm768_vm1 = vmmov 0   ;;  %s986_s1 = inlined_call_operand.vmem [shape: bf16[400,128], index: 1, kind: input, shape index: {}]   ;;  %s987_s0 = inlined_call_operand.vmem [shape: bf16[16,400], index: 0, kind: input, shape index: {}]   ;;  %s988_s3 = inlined_call_operand.vmem [shape: bf16[128,128], index: 3, kind: input, shape index: {}]   ;;  %s989_s5 = inlined_call_operand.vmem [shape: bf16[128,128], index: 5, kind: input, shape index: {}]   ;;  %s990_s2 = inlined_call_operand.vmem [shape: f32[1,128], index: 2, kind: input, shape index: {}]   ;;  %s991_s4 = inlined_call_operand.vmem [shape: f32[1,128], index: 4, kind: input, shape index: {}]   ;;  %s992_s6 = inlined_call_operand.vmem [shape: f32[1,128], index: 6, kind: input, shape index: {}]   ;;  %s993_s7 = inlined_call_operand.vmem [shape: f32[16,128], index: 7, kind: output, shape index: {}]  }
   0x1   :  { %302 = vmatprep.subr.bf16.mxu1 %v766_v0  ;;  %v711_v1 = vld [vmem:[%s986_s1 + $0x40] sm:$0xff]   ;;  %v714_v4 = vld [vmem:[%s986_s1 + $0x48] sm:$0xff]   ;;  %v717_v7 = vld [vmem:[%s986_s1 + $0x50] sm:$0xff]  }
   0x2   :  { %v712_v2 = vld [vmem:[%s986_s1 + $0x80] sm:$0xff]   ;;  %628 = vmatprep.subr.bf16.mxu0 %v711_v1  ;;  %v715_v5 = vld [vmem:[%s986_s1 + $0x88] sm:$0xff]   ;;  %v718_v8 = vld [vmem:[%s986_s1 + $0x90] sm:$0xff]  }
   0x3   :  { %v713_v3 = vld [vmem:[%s986_s1] sm:$0xff]   ;;  %303 = vmatpush1.bf16.msra.mxu1 %v712_v2  ;;  %v716_v6 = vld [vmem:[%s986_s1 + $0x8] sm:$0xff]   ;;  %v719_v9 = vld [vmem:[%s986_s1 + $0x10] sm:$0xff]  }
   0x4   :  { %629 = vmatpush3.bf16.msra.mxu0 %v713_v3  ;;  %304 = vmatprep.subr.bf16.mxu1 %v766_v0  ;;  %v720_v10 = vld [vmem:[%s986_s1 + $0x58] sm:$0xff]   ;;  %v723_v13 = vld [vmem:[%s986_s1 + $0x60] sm:$0xff]   ;;  %v726_v16 = vld [vmem:[%s986_s1 + $0x68] sm:$0xff]  }
   0x5   :  { %630 = vmatprep.subr.bf16.mxu0 %v714_v4  ;;  %v721_v11 = vld [vmem:[%s986_s1 + $0x98] sm:$0xff]   ;;  %v724_v14 = vld [vmem:[%s986_s1 + $0xa0] sm:$0xff]   ;;  %v727_v17 = vld [vmem:[%s986_s1 + $0xa8] sm:$0xff]  }
   0x6   :  { %v722_v12 = vld [vmem:[%s986_s1 + $0x18] sm:$0xff]   ;;  %v725_v15 = vld [vmem:[%s986_s1 + $0x20] sm:$0xff]   ;;  %v728_v18 = vld [vmem:[%s986_s1 + $0x28] sm:$0xff]  }
   0x7   :  { %305 = vmatpush1.bf16.msra.mxu1 %v715_v5  ;;  %v729_v19 = vld [vmem:[%s986_s1 + $0x70] sm:$0xff]   ;;  %v732_v22 = vld [vmem:[%s986_s1 + $0x78] sm:$0xff]   ;;  %v738_v28 = vld [vmem:[%s986_s1 + $0xc0] sm:$0xff]  }
   0x8   :  { %631 = vmatpush3.bf16.msra.mxu0 %v716_v6  ;;  %306 = vmatprep.subr.bf16.mxu1 %v766_v0  ;;  %v730_v20 = vld [vmem:[%s986_s1 + $0xb0] sm:$0xff]   ;;  %v733_v24 = vld [vmem:[%s986_s1 + $0xb8] sm:$0xff]   ;;  %v742_v29 = vld [vmem:[%s988_s3] sm:$0xff]  }
   0x9   :  { %632 = vmatprep.subr.bf16.mxu0 %v717_v7  ;;  %v731_v21 = vld [vmem:[%s986_s1 + $0x30] sm:$0xff]   ;;  %v741_v25 = vld [vmem:[%s987_s0 + $0xc] ss:$16 sps:$4 sm:$0xff]   ;;  %v739_v31 = vld [vmem:[%s987_s0 + $0x8] ss:$16 sps:$4 sm:$0xff]  }
   0xa   :  { %v737_v23 = vld [vmem:[%s987_s0 + $0x4] ss:$16 sps:$4 sm:$0xff]   ;;  %v734_v26 = vld [vmem:[%s986_s1 + $0x38] sm:$0xff]   ;;  %v735_v27 = vld [vmem:[%s987_s0] ss:$16 sps:$4 sm:$0xff]   ;;  %609 = vmatprep.mubr.msk.bf16.mxu1 %vm257_vm0, %v741_v25 }
   0xb   :  { %307 = vmatpush1.bf16.msra.mxu1 %v718_v8  ;;  %293 = vmatprep.mubr.bf16.mxu0 %v737_v23  ;;  %v743_v32 = vld [vmem:[%s988_s3 + $0x8] sm:$0xff]   ;;  %v744_v33 = vld [vmem:[%s988_s3 + $0x10] sm:$0xff]   ;;  %v745_v34 = vld [vmem:[%s988_s3 + $0x18] sm:$0xff]  }
   0xc   :  { %633 = vmatpush3.bf16.msra.mxu0 %v719_v9  ;;  %308 = vmatprep.subr.bf16.mxu1 %v766_v0  ;;  %v746_v35 = vld [vmem:[%s988_s3 + $0x20] sm:$0xff]   ;;  %v747_v36 = vld [vmem:[%s988_s3 + $0x28] sm:$0xff]   ;;  %v748_v37 = vld [vmem:[%s988_s3 + $0x30] sm:$0xff]  }
   0xd   :  { %634 = vmatprep.subr.bf16.mxu0 %v720_v10  ;;  %v749_v38 = vld [vmem:[%s988_s3 + $0x38] sm:$0xff]   ;;  %v750_v39 = vld [vmem:[%s989_s5] sm:$0xff]   ;;  %v751_v40 = vld [vmem:[%s989_s5 + $0x8] sm:$0xff]  }
   0xe   :  { %v752_v41 = vld [vmem:[%s989_s5 + $0x10] sm:$0xff]   ;;  %v753_v42 = vld [vmem:[%s989_s5 + $0x18] sm:$0xff]   ;;  %v579_v45 = vld [vmem:[%s990_s2] ss:$0 sm:$0xff] }
   0xf   :  { %309 = vmatpush1.bf16.msra.mxu1 %v721_v11  ;;  %v754_v61 = vld [vmem:[%s989_s5 + $0x20] sm:$0xff]   ;;  %v755_v62 = vld [vmem:[%s989_s5 + $0x28] sm:$0xff]   ;;  %v756_v63 = vld [vmem:[%s989_s5 + $0x30] sm:$0xff]  }
  0x10   :  { %635 = vmatpush3.bf16.msra.mxu0 %v722_v12  ;;  %310 = vmatprep.subr.bf16.mxu1 %v766_v0  ;;  %v610_v1 = vld [vmem:[%s991_s4] ss:$0 sm:$0xff] }
  0x11   :  { %636 = vmatprep.subr.bf16.mxu0 %v723_v13  ;;  %v619_v11 = vld [vmem:[%s992_s6] ss:$0 sm:$0xff] }
  0x13   :  { %311 = vmatpush1.bf16.msra.mxu1 %v724_v14 }
  0x14   :  { %637 = vmatpush3.bf16.msra.mxu0 %v725_v15  ;;  %312 = vmatprep.subr.bf16.mxu1 %v766_v0 }
  0x15   :  { %638 = vmatprep.subr.bf16.mxu0 %v726_v16 }
  0x17   :  { %313 = vmatpush1.bf16.msra.mxu1 %v727_v17 }
  0x18   :  { %639 = vmatpush3.bf16.msra.mxu0 %v728_v18  ;;  %314 = vmatprep.subr.bf16.mxu1 %v766_v0 }
  0x19   :  { %640 = vmatprep.subr.bf16.mxu0 %v729_v19 }
  0x1b   :  { %315 = vmatpush1.bf16.msra.mxu1 %v730_v20 }
  0x1c   :  { %641 = vmatpush3.bf16.msra.mxu0 %v731_v21  ;;  %316 = vmatprep.subr.bf16.mxu1 %v766_v0 }
  0x1d   :  { %642 = vmatprep.subr.bf16.mxu0 %v732_v22 }
  0x1f   :  { %317 = vmatpush1.bf16.msra.mxu1 %v733_v24 }
  0x20   :  { %643 = vmatpush3.bf16.msra.mxu0 %v734_v26  ;;  %318 = vmatprep.subr.bf16.mxu1 %v766_v0  ;;  %v757_v0 = vld [vmem:[%s989_s5 + $0x38] sm:$0xff]  }
  0x21   :  { %668 = vmatprep.subr.bf16.mxu0 %v767_v30 }
  0x23   :  { %294 = vmatmul.mubr.bf16.vlgmr.msra.gmra.mrb[0].mxu0 %v735_v27  ;;  %319 = vmatpush1.bf16.msra.mxu1 %v738_v28 }
  0x24   :  { %669 = vmatpush3.bf16.msra.mxu0 %v742_v29  ;;  %688 = vmatprep.subr.bf16.mxu1 %v767_v30 }
  0x25   :  { %670 = vmatprep.subr.bf16.mxu0 %v767_v30  ;;  %684 = vmatprep.mubr.msk.bf16.mxu0 %vm768_vm1, %v767_v30 }
  0x26   :  { %335 = vmatmul.mubr.bf16.vlgmr.msra.gmra.mrb[0].mxu1 %v739_v31 }
  0x27   :  { %704 = vmatprep.mubr.msk.bf16.mxu1 %vm768_vm1, %v767_v30  ;;  %689 = vmatpush3.bf16.msra.mxu1 %v750_v39 }
  0x28   :  { %671 = vmatpush3.bf16.msra.mxu0 %v743_v32  ;;  %690 = vmatprep.subr.bf16.mxu1 %v767_v30 }
  0x29   :  { %672 = vmatprep.subr.bf16.mxu0 %v767_v30 }
  0x2b   :  { %691 = vmatpush3.bf16.msra.mxu1 %v751_v40 }
  0x2c   :  { %673 = vmatpush3.bf16.msra.mxu0 %v744_v33  ;;  %692 = vmatprep.subr.bf16.mxu1 %v767_v30 }
  0x2d   :  { %674 = vmatprep.subr.bf16.mxu0 %v767_v30 }
  0x2f   :  { %693 = vmatpush3.bf16.msra.mxu1 %v752_v41 }
  0x30   :  { %675 = vmatpush3.bf16.msra.mxu0 %v745_v34  ;;  %694 = vmatprep.subr.bf16.mxu1 %v767_v30 }
  0x31   :  { %676 = vmatprep.subr.bf16.mxu0 %v767_v30 }
  0x33   :  { %695 = vmatpush3.bf16.msra.mxu1 %v753_v42 }
  0x34   :  { %677 = vmatpush3.bf16.msra.mxu0 %v746_v35  ;;  %696 = vmatprep.subr.bf16.mxu1 %v767_v30 }
  0x35   :  { %678 = vmatprep.subr.bf16.mxu0 %v767_v30 }
  0x37   :  { %697 = vmatpush3.bf16.msra.mxu1 %v754_v61 }
  0x38   :  { %679 = vmatpush3.bf16.msra.mxu0 %v747_v36  ;;  %698 = vmatprep.subr.bf16.mxu1 %v767_v30 }
  0x39   :  { %680 = vmatprep.subr.bf16.mxu0 %v767_v30 }
  0x3b   :  { %699 = vmatpush3.bf16.msra.mxu1 %v755_v62 }
  0x3c   :  { %681 = vmatpush3.bf16.msra.mxu0 %v748_v37  ;;  %700 = vmatprep.subr.bf16.mxu1 %v767_v30 }
  0x3d   :  { %682 = vmatprep.subr.bf16.mxu0 %v767_v30 }
  0x3f   :  { %701 = vmatpush3.bf16.msra.mxu1 %v756_v63 }
  0x40   :  { %683 = vmatpush3.bf16.msra.mxu0 %v749_v38  ;;  %702 = vmatprep.subr.bf16.mxu1 %v767_v30 }
  0x43   :  { %703 = vmatpush3.bf16.msra.mxu1 %v757_v0 }
  0xf6   :  { %v644_v43 = vpop.f32.mrb[0].mxu0 }
  0xf7   :  { %v645_v44 = vpop.f32.mrb[1].mxu0 }
  0xf8   :  { %v646_v46 = vadd.f32 %v645_v44, %v644_v43  ;;  %v647_v47 = vpop.f32.mrb[2].mxu0 }
  0xf9   :  { %v648_v48 = vpop.f32.mrb[3].mxu0  ;;  %v336_v49 = vpop.f32.mrb[0].mxu1 }
  0xfa   :  { %v649_v50 = vadd.f32 %v648_v48, %v647_v47  ;;  %v296_v51 = vadd.f32 %v646_v46, %v579_v45  ;;  %v338_v52 = vpop.f32.mrb[1].mxu1 }
  0xfb   :  { %v339_v53 = vpop.f32.mrb[2].mxu1 }
  0xfc   :  { %v337_v54 = vadd.f32 %v336_v49, %v296_v51  ;;  %v299_v55 = vadd.f32 %v649_v50, %v579_v45  ;;  %v341_v56 = vpop.f32.mrb[3].mxu1 }
  0xfe   :  { %v340_v57 = vadd.f32 %v339_v53, %v299_v55  ;;  %758 = vtanh.f32 %v337_v54 }
 0x100   :  { %760 = vtanh.f32 %v340_v57 }
 0x108   :  { %v759_v58 = vpop.eup %758 }
 0x10a   :  { %v761_v59 = vpop.eup %760 }
 0x10b   :  { %v345_v60 = vpack.c.bf16 %v761_v59, %v759_v58 }
 0x10d   :  { %685 = vmatmul.mubr.bf16.vlgmr.msra.gmra.mrb[4].mxu0 %v345_v60 }
 0x1e0   :  { %v451_v2 = vpop.f32.mrb[4].mxu0 }
 0x1e1   :  { %v452_v3 = vadd.f32 %v610_v1, %v451_v2  ;;  %v686_v4 = vpop.f32.mrb[5].mxu0 }
 0x1e2   :  { %v454_v5 = vpop.f32.mrb[6].mxu0 }
 0x1e3   :  { %v455_v6 = vadd.f32 %v610_v1, %v454_v5  ;;  %v687_v7 = vpop.f32.mrb[7].mxu0  ;;  %762 = vtanh.f32 %v452_v3 }
 0x1e5   :  { %764 = vtanh.f32 %v455_v6 }
 0x1ed   :  { %v763_v8 = vpop.eup %762 }
 0x1ef   :  { %v765_v9 = vpop.eup %764 }
 0x1f0   :  { %v460_v10 = vpack.c.bf16 %v765_v9, %v763_v8 }
 0x1f2   :  { %705 = vmatmul.mubr.bf16.vlgmr.msra.gmra.mrb[4].mxu1 %v460_v10 }
 0x2c5   :  { %v566_v12 = vpop.f32.mrb[4].mxu1 }
 0x2c6   :  { %v567_v13 = vadd.f32 %v619_v11, %v566_v12  ;;  %v706_v14 = vpop.f32.mrb[5].mxu1 }
 0x2c7   :  { %v569_v15 = vpop.f32.mrb[6].mxu1 }
 0x2c8   :  { %573 = vst [vmem:[%s993_s7] sm:$0xff] %v567_v13  ;;  %v570_v16 = vadd.f32 %v619_v11, %v569_v15  ;;  %v707_v17 = vpop.f32.mrb[7].mxu1 }
 0x2ca   :  { %574 = vst [vmem:[%s993_s7 + $0x8] sm:$0xff] %v570_v16 }

</bundles_post_ra>
